<compile_context>
chip_gen: v7x
topology: tpu7x:2x2x1
jax: 0.10.0
libtpu: 0.0.40
codegen_flags: <defaults>
</compile_context>

<pallas_src>
import functools
import math

import jax
import jax.numpy as jnp
from jax import lax
from jax.experimental import pallas as pl
from jax.experimental.pallas import tpu as pltpu


# ---------------------------------------------------------------------------
# shared math helpers (used inside the kernel and in the pure-JAX reference)
# ---------------------------------------------------------------------------
def _layer_norm(x, gamma, beta, eps=1e-5):
    mu = jnp.mean(x, axis=-1, keepdims=True)
    var = jnp.mean((x - mu) ** 2, axis=-1, keepdims=True)
    return (x - mu) * lax.rsqrt(var + eps) * gamma + beta


def _leaky_relu(x, slope=0.02):
    return jnp.maximum(x, slope * x)


def _relu(x):
    return jnp.maximum(x, 0.0)


def _bf16(x):
    return x.astype(jnp.bfloat16)


# ---------------------------------------------------------------------------
# fused Predictor kernel: grid = (batch, layer)
# ---------------------------------------------------------------------------
def predictor_kernel(h0_ref,
                     wqkv_ref, bqkv_ref, wo_ref, bo_ref, ln1g_ref, ln1b_ref,
                     w1_ref, b1_ref, w2_ref, b2_ref, ln2g_ref, ln2b_ref,
                     hw1_ref, hb1_ref, hlng_ref, hlnb_ref, hw2_ref, hb2_ref,
                     h_out_ref, attn_out_ref, out_ref,
                     *, num_heads, num_neurons):
    layer = pl.program_id(1)
    last_layer = pl.num_programs(1) - 1
    _, S, D = h0_ref.shape                     # per-batch block: (1, S, D)
    H = num_heads
    dh = D // H
    scale = 1.0 / math.sqrt(dh)
    f32 = jnp.float32

    # Layer 0: seed the resident carry.  h_out's block index is constant over the
    # layer axis, so it stays in VMEM across all layers of this batch element.
    @pl.when(layer == 0)
    def _():
        h_out_ref[...] = h0_ref[...]

    x = h_out_ref[0].astype(f32)                                      # (S, D)

    # ---- multi-head self-attention ----------------------------------------
    # Fused QKV projection: one (S, D) @ (D, 3D) MXU matmul (bf16 x bf16 -> f32).
    qkv = jnp.dot(_bf16(x), wqkv_ref[0],
                  preferred_element_type=f32) + bqkv_ref[0]           # (S, 3D)
    q = qkv[:, 0 * D:1 * D]
    k = qkv[:, 1 * D:2 * D]
    v = qkv[:, 2 * D:3 * D]

    # Per-head lane masks instead of dh-wide lane slices + stack/concatenate:
    # masked full-D contractions give identical per-head scores (cross-head terms
    # are multiplied by exact zeros) with no sub-128-lane relayouts or transposes.
    d_idx = lax.broadcasted_iota(jnp.int32, (H, D), 1)
    h_idx = lax.broadcasted_iota(jnp.int32, (H, D), 0)
    head_mask = ((d_idx >= h_idx * dh) & (d_idx < (h_idx + 1) * dh)).astype(f32)
    head_mask = head_mask[:, None, :]                                 # (H, 1, D)

    qh = q[None, :, :] * head_mask                                    # (H, S, D)
    kh = k[None, :, :] * head_mask
    vh = v[None, :, :] * head_mask

    scores = jnp.einsum("hqd,hkd->hqk", _bf16(qh), _bf16(kh),
                        preferred_element_type=f32) * scale           # (H, S, S)
    scores = scores - jnp.max(scores, axis=-1, keepdims=True)
    p = jnp.exp(scores)                                               # EUP
    attn = p * pl.reciprocal(jnp.sum(p, axis=-1, keepdims=True), approx=True)

    ctx_h = jnp.einsum("hqk,hkd->hqd", _bf16(attn), _bf16(vh),
                       preferred_element_type=f32)                    # (H, S, D)
    ctx = jnp.sum(ctx_h, axis=0)              # head merge (disjoint lanes) -> (S, D)

    attn_proj = jnp.dot(_bf16(ctx), wo_ref[0],
                        preferred_element_type=f32) + bo_ref[0]
    y = _layer_norm(x + attn_proj, ln1g_ref[0], ln1b_ref[0])

    # ---- feed-forward ------------------------------------------------------
    f = jnp.dot(_bf16(y), w1_ref[0], preferred_element_type=f32) + b1_ref[0]
    f = _leaky_relu(f)
    f = jnp.dot(_bf16(f), w2_ref[0], preferred_element_type=f32) + b2_ref[0]
    z = _layer_norm(y + f, ln2g_ref[0], ln2b_ref[0])

    h_out_ref[...] = z[None].astype(h_out_ref.dtype)

    # ---- last layer only: attention writeback + fused prediction heads ------
    @pl.when(layer == last_layer)
    def _():
        attn_out_ref[...] = attn[None].astype(attn_out_ref.dtype)

        nn_ = num_neurons
        pooled = jnp.sum(z, axis=0, keepdims=True)                    # (1, D)
        pooled3 = jnp.broadcast_to(pooled[None], (3, 1, D))           # (3, 1, D)
        # Three head-specific first Linears as one batched einsum.
        yh = jnp.einsum("hod,hdn->hon", _bf16(pooled3), hw1_ref[...],
                        preferred_element_type=f32)[:, 0, :] + hb1_ref[...]  # (3, nn)
        yh = _layer_norm(yh, hlng_ref[...], hlnb_ref[...])
        row = lax.broadcasted_iota(jnp.int32, (3, nn_), 0)
        zh = jnp.where(row == 0, _leaky_relu(yh),
                       jnp.where(row == 1, _relu(yh), jnp.tanh(yh)))
        # Second Linear of each head = f32 weighted row-sum on the VPU.
        o = jnp.sum(zh * hw2_ref[...], axis=-1, keepdims=True) + hb2_ref[...]  # (3, 1)
        row2 = row[:, :1]
        o = jnp.where(row2 == 0, _leaky_relu(o), _relu(o))
        out_ref[...] = o[None].astype(out_ref.dtype)                  # (1, 3, 1)


def predictor_forward(h, enc_params, head_params, num_heads, num_neurons):
    """Runs the full Predictor forward in a single pallas_call."""
    B, S, D = h.shape
    L = len(enc_params)
    H = num_heads
    nn_ = num_neurons
    Dffn = enc_params[0]["w1"].shape[-1]
    bf16 = jnp.bfloat16

    def stack(name, dt=jnp.float32):
        return jnp.stack([p[name] for p in enc_params]).astype(dt)

    # MXU weights shipped in bf16 (halves DMA/VMEM); biases & LN params stay f32.
    wqkv, bqkv = stack("wqkv", bf16), stack("bqkv")
    wo, bo = stack("wo", bf16), stack("bo")
    ln1g, ln1b = stack("ln1g"), stack("ln1b")
    w1, b1 = stack("w1", bf16), stack("b1")
    w2, b2 = stack("w2", bf16), stack("b2")
    ln2g, ln2b = stack("ln2g"), stack("ln2b")

    hw1 = head_params["w1"].astype(bf16)       # (3, D, nn)
    hb1 = head_params["b1"]                    # (3, nn)
    hlng, hlnb = head_params["lng"], head_params["lnb"]   # (3, nn) each
    hw2, hb2 = head_params["w2"], head_params["b2"]       # (3, nn), (3, 1)

    kernel = functools.partial(predictor_kernel, num_heads=H, num_neurons=nn_)

    lyr = lambda b, l: (l, 0, 0)               # per-layer stacked weights
    per_b = lambda b, l: (b, 0, 0)             # per-batch blocks (carry over layers)
    cst2 = lambda b, l: (0, 0)                 # resident head params (rank 2)
    cst3 = lambda b, l: (0, 0, 0)              # resident head params (rank 3)

    h_out, attn, out3 = pl.pallas_call(
        kernel,
        out_shape=(
            jax.ShapeDtypeStruct((B, S, D), h.dtype),
            jax.ShapeDtypeStruct((B, H, S, S), jnp.float32),
            jax.ShapeDtypeStruct((B, 3, 1), jnp.float32),
        ),
        grid_spec=pltpu.PrefetchScalarGridSpec(
            num_scalar_prefetch=0,
            grid=(B, L),
            in_specs=[
                pl.BlockSpec((1, S, D), per_b),            # h0
                pl.BlockSpec((1, D, 3 * D), lyr),          # fused Wqkv (bf16)
                pl.BlockSpec((1, 1, 3 * D), lyr),          # fused bqkv
                pl.BlockSpec((1, D, D), lyr),              # Wo (bf16)
                pl.BlockSpec((1, 1, D), lyr),              # bo
                pl.BlockSpec((1, 1, D), lyr),              # ln1 gamma
                pl.BlockSpec((1, 1, D), lyr),              # ln1 beta
                pl.BlockSpec((1, D, Dffn), lyr),           # ffn W1 (bf16)
                pl.BlockSpec((1, 1, Dffn), lyr),           # ffn b1
                pl.BlockSpec((1, Dffn, D), lyr),           # ffn W2 (bf16)
                pl.BlockSpec((1, 1, D), lyr),              # ffn b2
                pl.BlockSpec((1, 1, D), lyr),              # ln2 gamma
                pl.BlockSpec((1, 1, D), lyr),              # ln2 beta
                pl.BlockSpec((3, D, nn_), cst3),           # head W1 (bf16)
                pl.BlockSpec((3, nn_), cst2),              # head b1
                pl.BlockSpec((3, nn_), cst2),              # head LN gamma
                pl.BlockSpec((3, nn_), cst2),              # head LN beta
                pl.BlockSpec((3, nn_), cst2),              # head W2 rows
                pl.BlockSpec((3, 1), cst2),                # head b2
            ],
            out_specs=[
                pl.BlockSpec((1, S, D), per_b),                       # final h (carry)
                pl.BlockSpec((1, H, S, S), lambda b, l: (b, 0, 0, 0)),  # last attention
                pl.BlockSpec((1, 3, 1), per_b),                       # head outputs
            ],
        ),
        compiler_params=pltpu.CompilerParams(
            dimension_semantics=("parallel", "arbitrary")),
    )(h, wqkv, bqkv, wo, bo, ln1g, ln1b, w1, b1, w2, b2, ln2g, ln2b,
      hw1, hb1, hlng, hlnb, hw2, hb2)

    return out3.reshape(B, 3), h_out, attn


# ---------------------------------------------------------------------------
# parameter init (PyTorch nn.Linear-style) + pure-JAX reference
# ---------------------------------------------------------------------------
def _linear_params(key, fan_in, fan_out):
    kw, kb = jax.random.split(key)
    bound = 1.0 / math.sqrt(fan_in)
    w = jax.random.uniform(kw, (fan_in, fan_out), jnp.float32, -bound, bound)
    b = jax.random.uniform(kb, (1, fan_out), jnp.float32, -bound, bound)
    return w, b


def init_encoder_layer(key, D, Dffn):
    ks = jax.random.split(key, 6)
    wq, bq = _linear_params(ks[0], D, D)
    wk, bk = _linear_params(ks[1], D, D)
    wv, bv = _linear_params(ks[2], D, D)
    wo, bo = _linear_params(ks[3], D, D)
    w1, b1 = _linear_params(ks[4], D, Dffn)
    w2, b2 = _linear_params(ks[5], Dffn, D)
    return dict(
        wqkv=jnp.concatenate([wq, wk, wv], axis=1),
        bqkv=jnp.concatenate([bq, bk, bv], axis=1),
        wo=wo, bo=bo,
        ln1g=jnp.ones((1, D), jnp.float32), ln1b=jnp.zeros((1, D), jnp.float32),
        w1=w1, b1=b1, w2=w2, b2=b2,
        ln2g=jnp.ones((1, D), jnp.float32), ln2b=jnp.zeros((1, D), jnp.float32),
    )


def init_heads(key, D, nn_):
    ks = jax.random.split(key, 6)
    raw = []
    for i in range(3):
        wa, ba = _linear_params(ks[2 * i], D, nn_)
        wb, bb = _linear_params(ks[2 * i + 1], nn_, 1)
        raw.append(dict(wa=wa, ba=ba,
                        gamma=jnp.ones((1, nn_), jnp.float32),
                        beta=jnp.zeros((1, nn_), jnp.float32),
                        wb=wb, bb=bb))
    packed = dict(
        w1=jnp.stack([r["wa"] for r in raw], axis=0),          # (3, D, nn)
        b1=jnp.stack([r["ba"][0] for r in raw], axis=0),       # (3, nn)
        lng=jnp.concatenate([r["gamma"] for r in raw], axis=0),  # (3, nn)
        lnb=jnp.concatenate([r["beta"] for r in raw], axis=0),   # (3, nn)
        w2=jnp.stack([r["wb"][:, 0] for r in raw], axis=0),    # (3, nn)
        b2=jnp.stack([r["bb"][0] for r in raw], axis=0),       # (3, 1)
    )
    return raw, packed


def _mm(a, b):
    # bf16 x bf16 -> f32: mirrors the kernel's MXU precision policy.
    return jnp.dot(a.astype(jnp.bfloat16), b.astype(jnp.bfloat16),
                   preferred_element_type=jnp.float32)


def ref_encoder_layer(h, p, H):
    B, S, D = h.shape
    dh = D // H
    x2 = h.reshape(B * S, D)
    qkv = _mm(x2, p["wqkv"]) + p["bqkv"]
    q, k, v = jnp.split(qkv, 3, axis=-1)
    sh = lambda t: t.reshape(B, S, H, dh).transpose(0, 2, 1, 3)
    q, k, v = sh(q), sh(k), sh(v)
    scores = jnp.einsum("bhqd,bhkd->bhqk",
                        q.astype(jnp.bfloat16), k.astype(jnp.bfloat16),
                        preferred_element_type=jnp.float32) / math.sqrt(dh)
    attn = jax.nn.softmax(scores, axis=-1)
    ctx = jnp.einsum("bhqk,bhkd->bhqd",
                     attn.astype(jnp.bfloat16), v.astype(jnp.bfloat16),
                     preferred_element_type=jnp.float32)
    ctx = ctx.transpose(0, 2, 1, 3).reshape(B * S, D)
    y = _layer_norm(x2 + _mm(ctx, p["wo"]) + p["bo"], p["ln1g"], p["ln1b"])
    f = _mm(_leaky_relu(_mm(y, p["w1"]) + p["b1"]), p["w2"]) + p["b2"]
    z = _layer_norm(y + f, p["ln2g"], p["ln2b"])
    return z.reshape(B, S, D), attn


def ref_predictor(h, enc_params, raw_heads, H):
    attn = None
    for p in enc_params:
        h, attn = ref_encoder_layer(h, p, H)
    pooled = h.sum(axis=1)
    acts1 = [_leaky_relu, _relu, jnp.tanh]
    acts2 = [_leaky_relu, _relu, _relu]
    outs = []
    for i, r in enumerate(raw_heads):
        y = _mm(pooled, r["wa"]) + r["ba"]
        zz = acts1[i](_layer_norm(y, r["gamma"], r["beta"]))
        outs.append(acts2[i](zz @ r["wb"] + r["bb"]))
    return jnp.concatenate(outs, axis=-1), h, attn


# ---------------------------------------------------------------------------
if __name__ == "__main__":
    B, S = 2, 8
    latent_size, num_encoder, num_heads, num_ffn, num_neurons = 32, 2, 4, 64, 32

    key = jax.random.PRNGKey(0)
    k_h, k_enc, k_heads = jax.random.split(key, 3)

    h0 = jax.random.normal(k_h, (B, S, latent_size), dtype=jnp.float32)
    enc_params = [init_encoder_layer(k, latent_size, num_ffn)
                  for k in jax.random.split(k_enc, num_encoder)]
    raw_heads, packed_heads = init_heads(k_heads, latent_size, num_neurons)

    out, h_final, last_attn = predictor_forward(h0, enc_params, packed_heads,
                                                num_heads, num_neurons)
    out, h_final, last_attn = jax.block_until_ready((out, h_final, last_attn))

    out_ref, h_ref, attn_ref = ref_predictor(h0, enc_params, raw_heads, num_heads)

    assert out.shape == (B, 3)
    assert h_final.shape == (B, S, latent_size)
    assert last_attn.shape == (B, num_heads, S, S)
    assert jnp.allclose(out, out_ref, atol=2e-2, rtol=2e-2), "out mismatch vs. reference"
    assert jnp.allclose(h_final, h_ref, atol=2e-2, rtol=2e-2), "h mismatch vs. reference"
    assert jnp.allclose(last_attn, attn_ref, atol=2e-2, rtol=2e-2), "attn mismatch vs. reference"

    print("KERNEL_OK")
</pallas_src>

<mosaic_0001>
module attributes {stable_mosaic.version = 11 : i64} {
  func.func @predictor_kernel(%arg0: i32, %arg1: i32, %arg2: memref<1x8x32xf32, #tpu.memory_space<vmem>>, %arg3: memref<1x32x96xbf16, #tpu.memory_space<vmem>>, %arg4: memref<1x1x96xf32, #tpu.memory_space<vmem>>, %arg5: memref<1x32x32xbf16, #tpu.memory_space<vmem>>, %arg6: memref<1x1x32xf32, #tpu.memory_space<vmem>>, %arg7: memref<1x1x32xf32, #tpu.memory_space<vmem>>, %arg8: memref<1x1x32xf32, #tpu.memory_space<vmem>>, %arg9: memref<1x32x64xbf16, #tpu.memory_space<vmem>>, %arg10: memref<1x1x64xf32, #tpu.memory_space<vmem>>, %arg11: memref<1x64x32xbf16, #tpu.memory_space<vmem>>, %arg12: memref<1x1x32xf32, #tpu.memory_space<vmem>>, %arg13: memref<1x1x32xf32, #tpu.memory_space<vmem>>, %arg14: memref<1x1x32xf32, #tpu.memory_space<vmem>>, %arg15: memref<3x32x32xbf16, #tpu.memory_space<vmem>>, %arg16: memref<3x32xf32, #tpu.memory_space<vmem>>, %arg17: memref<3x32xf32, #tpu.memory_space<vmem>>, %arg18: memref<3x32xf32, #tpu.memory_space<vmem>>, %arg19: memref<3x32xf32, #tpu.memory_space<vmem>>, %arg20: memref<3x1xf32, #tpu.memory_space<vmem>>, %arg21: memref<1x8x32xf32, #tpu.memory_space<vmem>>, %arg22: memref<1x4x8x8xf32, #tpu.memory_space<vmem>>, %arg23: memref<1x3x1xf32, #tpu.memory_space<vmem>>) attributes {dimension_semantics = [#tpu.dimension_semantics<parallel>, #tpu.dimension_semantics<arbitrary>], iteration_bounds = array<i64: 2, 2>, scalar_prefetch = 0 : i64, scratch_operands = 0 : i64, tpu.core_type = #tpu.core_type<tc>, window_params = [{transform_indices = @transform_0, window_bounds = array<i64: 1, 8, 32>}, {transform_indices = @transform_1, window_bounds = array<i64: 1, 32, 96>}, {transform_indices = @transform_2, window_bounds = array<i64: 1, 1, 96>}, {transform_indices = @transform_3, window_bounds = array<i64: 1, 32, 32>}, {transform_indices = @transform_4, window_bounds = array<i64: 1, 1, 32>}, {transform_indices = @transform_5, window_bounds = array<i64: 1, 1, 32>}, {transform_indices = @transform_6, window_bounds = array<i64: 1, 1, 32>}, {transform_indices = @transform_7, window_bounds = array<i64: 1, 32, 64>}, {transform_indices = @transform_8, window_bounds = array<i64: 1, 1, 64>}, {transform_indices = @transform_9, window_bounds = array<i64: 1, 64, 32>}, {transform_indices = @transform_10, window_bounds = array<i64: 1, 1, 32>}, {transform_indices = @transform_11, window_bounds = array<i64: 1, 1, 32>}, {transform_indices = @transform_12, window_bounds = array<i64: 1, 1, 32>}, {pipeline_mode = #tpu.pipeline_mode<synchronous>, transform_indices = @transform_13, window_bounds = array<i64: 3, 32, 32>}, {pipeline_mode = #tpu.pipeline_mode<synchronous>, transform_indices = @transform_14, window_bounds = array<i64: 3, 32>}, {pipeline_mode = #tpu.pipeline_mode<synchronous>, transform_indices = @transform_15, window_bounds = array<i64: 3, 32>}, {pipeline_mode = #tpu.pipeline_mode<synchronous>, transform_indices = @transform_16, window_bounds = array<i64: 3, 32>}, {pipeline_mode = #tpu.pipeline_mode<synchronous>, transform_indices = @transform_17, window_bounds = array<i64: 3, 32>}, {pipeline_mode = #tpu.pipeline_mode<synchronous>, transform_indices = @transform_18, window_bounds = array<i64: 3, 1>}, {transform_indices = @transform_19, window_bounds = array<i64: 1, 8, 32>}, {transform_indices = @transform_20, window_bounds = array<i64: 1, 4, 8, 8>}, {transform_indices = @transform_21, window_bounds = array<i64: 1, 3, 1>}]} {
    %c0_i32 = arith.constant 0 : i32
    %0 = arith.cmpi eq, %arg1, %c0_i32 : i32
    %1 = arith.extui %0 : i1 to i32
    %c0_i32_0 = arith.constant 0 : i32
    %2 = arith.cmpi ne, %1, %c0_i32_0 : i32
    scf.if %2 {
      %c0_65 = arith.constant 0 : index
      %c0_66 = arith.constant 0 : index
      %c0_67 = arith.constant 0 : index
      %147 = vector.load %arg2[%c0_65, %c0_66, %c0_67] : memref<1x8x32xf32, #tpu.memory_space<vmem>>, vector<1x8x32xf32>
      %c0_68 = arith.constant 0 : index
      %c0_69 = arith.constant 0 : index
      %c0_70 = arith.constant 0 : index
      %148 = vector.load %arg21[%c0_68, %c0_69, %c0_70] : memref<1x8x32xf32, #tpu.memory_space<vmem>>, vector<1x8x32xf32>
      tpu.vector_store %arg21[%c0_68, %c0_69, %c0_70], %147 {strides = array<i32>} : memref<1x8x32xf32, #tpu.memory_space<vmem>>, vector<1x8x32xf32>,
    } else {
    }
    %c0 = arith.constant 0 : index
    %c0_1 = arith.constant 0 : index
    %c0_2 = arith.constant 0 : index
    %3 = vector.load %arg21[%c0, %c0_1, %c0_2] : memref<1x8x32xf32, #tpu.memory_space<vmem>>, vector<1x8x32xf32>
    %4 = vector.shape_cast %3 : vector<1x8x32xf32> to vector<8x32xf32>
    %5 = arith.truncf %4 : vector<8x32xf32> to vector<8x32xbf16>
    %c0_3 = arith.constant 0 : index
    %c0_4 = arith.constant 0 : index
    %c0_5 = arith.constant 0 : index
    %6 = vector.load %arg3[%c0_3, %c0_4, %c0_5] : memref<1x32x96xbf16, #tpu.memory_space<vmem>>, vector<1x32x96xbf16>
    %7 = vector.shape_cast %6 : vector<1x32x96xbf16> to vector<32x96xbf16>
    %cst = arith.constant dense<0.000000e+00> : vector<8x96xf32>
    %8 = tpu.matmul %5, %7, %cst {dimension_numbers = #tpu.dot_dimension_numbers<[1], [0], [0], [1], [0, 0, 1, 1], [], []>} : vector<8x32xbf16>, vector<32x96xbf16>, vector<8x96xf32> -> vector<8x96xf32>
    %c0_6 = arith.constant 0 : index
    %c0_7 = arith.constant 0 : index
    %c0_8 = arith.constant 0 : index
    %9 = vector.load %arg4[%c0_6, %c0_7, %c0_8] : memref<1x1x96xf32, #tpu.memory_space<vmem>>, vector<1x1x96xf32>
    %10 = vector.shape_cast %9 : vector<1x1x96xf32> to vector<1x96xf32>
    %11 = vector.broadcast %10 : vector<1x96xf32> to vector<8x96xf32>
    %12 = arith.addf %8, %11 : vector<8x96xf32>
    %13 = vector.extract_strided_slice %12 {offsets = [0, 0], sizes = [8, 32], strides = [1, 1]} : vector<8x96xf32> to vector<8x32xf32>
    %14 = vector.extract_strided_slice %12 {offsets = [0, 32], sizes = [8, 32], strides = [1, 1]} : vector<8x96xf32> to vector<8x32xf32>
    %15 = vector.extract_strided_slice %12 {offsets = [0, 64], sizes = [8, 32], strides = [1, 1]} : vector<8x96xf32> to vector<8x32xf32>
    %16 = tpu.iota {dimensions = array<i32: 1>} : vector<4x32xi32>
    %17 = tpu.iota {dimensions = array<i32: 0>} : vector<4x32xi32>
    %c8_i32 = arith.constant 8 : i32
    %18 = vector.broadcast %c8_i32 : i32 to vector<4x32xi32>
    %19 = arith.muli %17, %18 : vector<4x32xi32>
    %20 = arith.cmpi sge, %16, %19 : vector<4x32xi32>
    %c1_i32 = arith.constant 1 : i32
    %21 = vector.broadcast %c1_i32 : i32 to vector<4x32xi32>
    %22 = arith.addi %17, %21 : vector<4x32xi32>
    %c8_i32_9 = arith.constant 8 : i32
    %23 = vector.broadcast %c8_i32_9 : i32 to vector<4x32xi32>
    %24 = arith.muli %22, %23 : vector<4x32xi32>
    %25 = arith.cmpi slt, %16, %24 : vector<4x32xi32>
    %26 = arith.andi %20, %25 : vector<4x32xi1>
    %27 = arith.extui %26 : vector<4x32xi1> to vector<4x32xi32>
    %28 = arith.sitofp %27 : vector<4x32xi32> to vector<4x32xf32>
    %29 = vector.shape_cast %28 : vector<4x32xf32> to vector<4x1x32xf32>
    %30 = vector.shape_cast %13 : vector<8x32xf32> to vector<1x8x32xf32>
    %31 = vector.broadcast %30 : vector<1x8x32xf32> to vector<4x8x32xf32>
    %32 = vector.broadcast %29 : vector<4x1x32xf32> to vector<4x8x32xf32>
    %33 = arith.mulf %31, %32 : vector<4x8x32xf32>
    %34 = vector.shape_cast %14 : vector<8x32xf32> to vector<1x8x32xf32>
    %35 = vector.broadcast %34 : vector<1x8x32xf32> to vector<4x8x32xf32>
    %36 = vector.broadcast %29 : vector<4x1x32xf32> to vector<4x8x32xf32>
    %37 = arith.mulf %35, %36 : vector<4x8x32xf32>
    %38 = vector.shape_cast %15 : vector<8x32xf32> to vector<1x8x32xf32>
    %39 = vector.broadcast %38 : vector<1x8x32xf32> to vector<4x8x32xf32>
    %40 = vector.broadcast %29 : vector<4x1x32xf32> to vector<4x8x32xf32>
    %41 = arith.mulf %39, %40 : vector<4x8x32xf32>
    %42 = arith.truncf %33 : vector<4x8x32xf32> to vector<4x8x32xbf16>
    %43 = arith.truncf %37 : vector<4x8x32xf32> to vector<4x8x32xbf16>
    "tpu.trace_start"() <{level = 10 : i32, message = "hqd,hkd->hqk"}> : () -> ()
    %cst_10 = arith.constant dense<0.000000e+00> : vector<4x8x8xf32>
    %44 = tpu.matmul %42, %43, %cst_10 {dimension_numbers = #tpu.dot_dimension_numbers<[2], [2], [1], [1], [0, 0, 0, 1, 1, 1], [0], [0]>} : vector<4x8x32xbf16>, vector<4x8x32xbf16>, vector<4x8x8xf32> -> vector<4x8x8xf32>
    "tpu.trace_stop"() : () -> ()
    %cst_11 = arith.constant 0.353553385 : f32
    %45 = vector.broadcast %cst_11 : f32 to vector<4x8x8xf32>
    %46 = arith.mulf %44, %45 : vector<4x8x8xf32>
    %cst_12 = arith.constant dense<0xFF800000> : vector<4x8xf32>
    %47 = vector.multi_reduction <maximumf>, %46, %cst_12 [2] : vector<4x8x8xf32> to vector<4x8xf32>
    %48 = vector.shape_cast %47 : vector<4x8xf32> to vector<4x8x1xf32>
    %49 = vector.broadcast %48 : vector<4x8x1xf32> to vector<4x8x8xf32>
    %50 = arith.subf %46, %49 : vector<4x8x8xf32>
    %51 = math.exp %50 : vector<4x8x8xf32>
    %cst_13 = arith.constant dense<0.000000e+00> : vector<4x8xf32>
    %52 = vector.multi_reduction <add>, %51, %cst_13 [2] : vector<4x8x8xf32> to vector<4x8xf32>
    %53 = vector.shape_cast %52 : vector<4x8xf32> to vector<4x8x1xf32>
    %54 = tpu.reciprocal %53 {approx = true} : vector<4x8x1xf32> -> vector<4x8x1xf32>
    %55 = vector.broadcast %54 : vector<4x8x1xf32> to vector<4x8x8xf32>
    %56 = arith.mulf %51, %55 : vector<4x8x8xf32>
    %57 = arith.truncf %56 : vector<4x8x8xf32> to vector<4x8x8xbf16>
    %58 = arith.truncf %41 : vector<4x8x32xf32> to vector<4x8x32xbf16>
    "tpu.trace_start"() <{level = 10 : i32, message = "hqk,hkd->hqd"}> : () -> ()
    %cst_14 = arith.constant dense<0.000000e+00> : vector<4x8x32xf32>
    %59 = tpu.matmul %57, %58, %cst_14 {dimension_numbers = #tpu.dot_dimension_numbers<[2], [1], [1], [2], [0, 0, 0, 1, 1, 2], [0], [0]>} : vector<4x8x8xbf16>, vector<4x8x32xbf16>, vector<4x8x32xf32> -> vector<4x8x32xf32>
    "tpu.trace_stop"() : () -> ()
    %cst_15 = arith.constant dense<0.000000e+00> : vector<8x32xf32>
    %60 = vector.multi_reduction <add>, %59, %cst_15 [0] : vector<4x8x32xf32> to vector<8x32xf32>
    %61 = arith.truncf %60 : vector<8x32xf32> to vector<8x32xbf16>
    %c0_16 = arith.constant 0 : index
    %c0_17 = arith.constant 0 : index
    %c0_18 = arith.constant 0 : index
    %62 = vector.load %arg5[%c0_16, %c0_17, %c0_18] : memref<1x32x32xbf16, #tpu.memory_space<vmem>>, vector<1x32x32xbf16>
    %63 = vector.shape_cast %62 : vector<1x32x32xbf16> to vector<32x32xbf16>
    %cst_19 = arith.constant dense<0.000000e+00> : vector<8x32xf32>
    %64 = tpu.matmul %61, %63, %cst_19 {dimension_numbers = #tpu.dot_dimension_numbers<[1], [0], [0], [1], [0, 0, 1, 1], [], []>} : vector<8x32xbf16>, vector<32x32xbf16>, vector<8x32xf32> -> vector<8x32xf32>
    %c0_20 = arith.constant 0 : index
    %c0_21 = arith.constant 0 : index
    %c0_22 = arith.constant 0 : index
    %65 = vector.load %arg6[%c0_20, %c0_21, %c0_22] : memref<1x1x32xf32, #tpu.memory_space<vmem>>, vector<1x1x32xf32>
    %66 = vector.shape_cast %65 : vector<1x1x32xf32> to vector<1x32xf32>
    %67 = vector.broadcast %66 : vector<1x32xf32> to vector<8x32xf32>
    %68 = arith.addf %64, %67 : vector<8x32xf32>
    %69 = arith.addf %4, %68 : vector<8x32xf32>
    %c0_23 = arith.constant 0 : index
    %c0_24 = arith.constant 0 : index
    %c0_25 = arith.constant 0 : index
    %70 = vector.load %arg7[%c0_23, %c0_24, %c0_25] : memref<1x1x32xf32, #tpu.memory_space<vmem>>, vector<1x1x32xf32>
    %71 = vector.shape_cast %70 : vector<1x1x32xf32> to vector<1x32xf32>
    %c0_26 = arith.constant 0 : index
    %c0_27 = arith.constant 0 : index
    %c0_28 = arith.constant 0 : index
    %72 = vector.load %arg8[%c0_26, %c0_27, %c0_28] : memref<1x1x32xf32, #tpu.memory_space<vmem>>, vector<1x1x32xf32>
    %73 = vector.shape_cast %72 : vector<1x1x32xf32> to vector<1x32xf32>
    %cst_29 = arith.constant dense<0.000000e+00> : vector<8xf32>
    %74 = vector.multi_reduction <add>, %69, %cst_29 [1] : vector<8x32xf32> to vector<8xf32>
    %75 = vector.shape_cast %74 : vector<8xf32> to vector<8x1xf32>
    %cst_30 = arith.constant 3.200000e+01 : f32
    %76 = vector.broadcast %cst_30 : f32 to vector<8x1xf32>
    %77 = arith.divf %75, %76 : vector<8x1xf32>
    %78 = vector.broadcast %77 : vector<8x1xf32> to vector<8x32xf32>
    %79 = arith.subf %69, %78 : vector<8x32xf32>
    %80 = arith.mulf %79, %79 : vector<8x32xf32>
    %cst_31 = arith.constant dense<0.000000e+00> : vector<8xf32>
    %81 = vector.multi_reduction <add>, %80, %cst_31 [1] : vector<8x32xf32> to vector<8xf32>
    %82 = vector.shape_cast %81 : vector<8xf32> to vector<8x1xf32>
    %cst_32 = arith.constant 3.200000e+01 : f32
    %83 = vector.broadcast %cst_32 : f32 to vector<8x1xf32>
    %84 = arith.divf %82, %83 : vector<8x1xf32>
    %85 = vector.broadcast %77 : vector<8x1xf32> to vector<8x32xf32>
    %86 = arith.subf %69, %85 : vector<8x32xf32>
    %cst_33 = arith.constant 9.99999974E-6 : f32
    %87 = vector.broadcast %cst_33 : f32 to vector<8x1xf32>
    %88 = arith.addf %84, %87 : vector<8x1xf32>
    %89 = math.rsqrt %88 : vector<8x1xf32>
    %90 = vector.broadcast %89 : vector<8x1xf32> to vector<8x32xf32>
    %91 = arith.mulf %86, %90 : vector<8x32xf32>
    %92 = vector.broadcast %71 : vector<1x32xf32> to vector<8x32xf32>
    %93 = arith.mulf %91, %92 : vector<8x32xf32>
    %94 = vector.broadcast %73 : vector<1x32xf32> to vector<8x32xf32>
    %95 = arith.addf %93, %94 : vector<8x32xf32>
    %96 = arith.truncf %95 : vector<8x32xf32> to vector<8x32xbf16>
    %c0_34 = arith.constant 0 : index
    %c0_35 = arith.constant 0 : index
    %c0_36 = arith.constant 0 : index
    %97 = vector.load %arg9[%c0_34, %c0_35, %c0_36] : memref<1x32x64xbf16, #tpu.memory_space<vmem>>, vector<1x32x64xbf16>
    %98 = vector.shape_cast %97 : vector<1x32x64xbf16> to vector<32x64xbf16>
    %cst_37 = arith.constant dense<0.000000e+00> : vector<8x64xf32>
    %99 = tpu.matmul %96, %98, %cst_37 {dimension_numbers = #tpu.dot_dimension_numbers<[1], [0], [0], [1], [0, 0, 1, 1], [], []>} : vector<8x32xbf16>, vector<32x64xbf16>, vector<8x64xf32> -> vector<8x64xf32>
    %c0_38 = arith.constant 0 : index
    %c0_39 = arith.constant 0 : index
    %c0_40 = arith.constant 0 : index
    %100 = vector.load %arg10[%c0_38, %c0_39, %c0_40] : memref<1x1x64xf32, #tpu.memory_space<vmem>>, vector<1x1x64xf32>
    %101 = vector.shape_cast %100 : vector<1x1x64xf32> to vector<1x64xf32>
    %102 = vector.broadcast %101 : vector<1x64xf32> to vector<8x64xf32>
    %103 = arith.addf %99, %102 : vector<8x64xf32>
    %cst_41 = arith.constant 2.000000e-02 : f32
    %104 = vector.broadcast %cst_41 : f32 to vector<8x64xf32>
    %105 = arith.mulf %104, %103 : vector<8x64xf32>
    %106 = arith.maximumf %103, %105 : vector<8x64xf32>
    %107 = arith.truncf %106 : vector<8x64xf32> to vector<8x64xbf16>
    %c0_42 = arith.constant 0 : index
    %c0_43 = arith.constant 0 : index
    %c0_44 = arith.constant 0 : index
    %108 = vector.load %arg11[%c0_42, %c0_43, %c0_44] : memref<1x64x32xbf16, #tpu.memory_space<vmem>>, vector<1x64x32xbf16>
    %109 = vector.shape_cast %108 : vector<1x64x32xbf16> to vector<64x32xbf16>
    %cst_45 = arith.constant dense<0.000000e+00> : vector<8x32xf32>
    %110 = tpu.matmul %107, %109, %cst_45 {dimension_numbers = #tpu.dot_dimension_numbers<[1], [0], [0], [1], [0, 0, 1, 1], [], []>} : vector<8x64xbf16>, vector<64x32xbf16>, vector<8x32xf32> -> vector<8x32xf32>
    %c0_46 = arith.constant 0 : index
    %c0_47 = arith.constant 0 : index
    %c0_48 = arith.constant 0 : index
    %111 = vector.load %arg12[%c0_46, %c0_47, %c0_48] : memref<1x1x32xf32, #tpu.memory_space<vmem>>, vector<1x1x32xf32>
    %112 = vector.shape_cast %111 : vector<1x1x32xf32> to vector<1x32xf32>
    %113 = vector.broadcast %112 : vector<1x32xf32> to vector<8x32xf32>
    %114 = arith.addf %110, %113 : vector<8x32xf32>
    %115 = arith.addf %95, %114 : vector<8x32xf32>
    %c0_49 = arith.constant 0 : index
    %c0_50 = arith.constant 0 : index
    %c0_51 = arith.constant 0 : index
    %116 = vector.load %arg13[%c0_49, %c0_50, %c0_51] : memref<1x1x32xf32, #tpu.memory_space<vmem>>, vector<1x1x32xf32>
    %117 = vector.shape_cast %116 : vector<1x1x32xf32> to vector<1x32xf32>
    %c0_52 = arith.constant 0 : index
    %c0_53 = arith.constant 0 : index
    %c0_54 = arith.constant 0 : index
    %118 = vector.load %arg14[%c0_52, %c0_53, %c0_54] : memref<1x1x32xf32, #tpu.memory_space<vmem>>, vector<1x1x32xf32>
    %119 = vector.shape_cast %118 : vector<1x1x32xf32> to vector<1x32xf32>
    %cst_55 = arith.constant dense<0.000000e+00> : vector<8xf32>
    %120 = vector.multi_reduction <add>, %115, %cst_55 [1] : vector<8x32xf32> to vector<8xf32>
    %121 = vector.shape_cast %120 : vector<8xf32> to vector<8x1xf32>
    %cst_56 = arith.constant 3.200000e+01 : f32
    %122 = vector.broadcast %cst_56 : f32 to vector<8x1xf32>
    %123 = arith.divf %121, %122 : vector<8x1xf32>
    %124 = vector.broadcast %123 : vector<8x1xf32> to vector<8x32xf32>
    %125 = arith.subf %115, %124 : vector<8x32xf32>
    %126 = arith.mulf %125, %125 : vector<8x32xf32>
    %cst_57 = arith.constant dense<0.000000e+00> : vector<8xf32>
    %127 = vector.multi_reduction <add>, %126, %cst_57 [1] : vector<8x32xf32> to vector<8xf32>
    %128 = vector.shape_cast %127 : vector<8xf32> to vector<8x1xf32>
    %cst_58 = arith.constant 3.200000e+01 : f32
    %129 = vector.broadcast %cst_58 : f32 to vector<8x1xf32>
    %130 = arith.divf %128, %129 : vector<8x1xf32>
    %131 = vector.broadcast %123 : vector<8x1xf32> to vector<8x32xf32>
    %132 = arith.subf %115, %131 : vector<8x32xf32>
    %cst_59 = arith.constant 9.99999974E-6 : f32
    %133 = vector.broadcast %cst_59 : f32 to vector<8x1xf32>
    %134 = arith.addf %130, %133 : vector<8x1xf32>
    %135 = math.rsqrt %134 : vector<8x1xf32>
    %136 = vector.broadcast %135 : vector<8x1xf32> to vector<8x32xf32>
    %137 = arith.mulf %132, %136 : vector<8x32xf32>
    %138 = vector.broadcast %117 : vector<1x32xf32> to vector<8x32xf32>
    %139 = arith.mulf %137, %138 : vector<8x32xf32>
    %140 = vector.broadcast %119 : vector<1x32xf32> to vector<8x32xf32>
    %141 = arith.addf %139, %140 : vector<8x32xf32>
    %142 = vector.shape_cast %141 : vector<8x32xf32> to vector<1x8x32xf32>
    %c0_60 = arith.constant 0 : index
    %c0_61 = arith.constant 0 : index
    %c0_62 = arith.constant 0 : index
    %143 = vector.load %arg21[%c0_60, %c0_61, %c0_62] : memref<1x8x32xf32, #tpu.memory_space<vmem>>, vector<1x8x32xf32>
    tpu.vector_store %arg21[%c0_60, %c0_61, %c0_62], %142 {strides = array<i32>} : memref<1x8x32xf32, #tpu.memory_space<vmem>>, vector<1x8x32xf32>,
    %c1_i32_63 = arith.constant 1 : i32
    %144 = arith.cmpi eq, %arg1, %c1_i32_63 : i32
    %145 = arith.extui %144 : i1 to i32
    %c0_i32_64 = arith.constant 0 : i32
    %146 = arith.cmpi ne, %145, %c0_i32_64 : i32
    scf.if %146 {
      %147 = vector.shape_cast %56 : vector<4x8x8xf32> to vector<1x4x8x8xf32>
      %c0_65 = arith.constant 0 : index
      %c0_66 = arith.constant 0 : index
      %c0_67 = arith.constant 0 : index
      %c0_68 = arith.constant 0 : index
      %148 = vector.load %arg22[%c0_65, %c0_66, %c0_67, %c0_68] : memref<1x4x8x8xf32, #tpu.memory_space<vmem>>, vector<1x4x8x8xf32>
      tpu.vector_store %arg22[%c0_65, %c0_66, %c0_67, %c0_68], %147 {strides = array<i32>} : memref<1x4x8x8xf32, #tpu.memory_space<vmem>>, vector<1x4x8x8xf32>,
      %cst_69 = arith.constant dense<0.000000e+00> : vector<32xf32>
      %149 = vector.multi_reduction <add>, %141, %cst_69 [0] : vector<8x32xf32> to vector<32xf32>
      %150 = vector.shape_cast %149 : vector<32xf32> to vector<1x32xf32>
      %151 = vector.shape_cast %150 : vector<1x32xf32> to vector<1x1x32xf32>
      %152 = vector.shape_cast %151 : vector<1x1x32xf32> to vector<1x1x32xf32>
      %153 = vector.broadcast %152 : vector<1x1x32xf32> to vector<3x1x32xf32>
      %154 = arith.truncf %153 : vector<3x1x32xf32> to vector<3x1x32xbf16>
      %c0_70 = arith.constant 0 : index
      %c0_71 = arith.constant 0 : index
      %c0_72 = arith.constant 0 : index
      %155 = vector.load %arg15[%c0_70, %c0_71, %c0_72] : memref<3x32x32xbf16, #tpu.memory_space<vmem>>, vector<3x32x32xbf16>
      "tpu.trace_start"() <{level = 10 : i32, message = "hod,hdn->hon"}> : () -> ()
      %cst_73 = arith.constant dense<0.000000e+00> : vector<3x1x32xf32>
      %156 = tpu.matmul %154, %155, %cst_73 {dimension_numbers = #tpu.dot_dimension_numbers<[2], [1], [1], [2], [0, 0, 0, 1, 1, 2], [0], [0]>} : vector<3x1x32xbf16>, vector<3x32x32xbf16>, vector<3x1x32xf32> -> vector<3x1x32xf32>
      "tpu.trace_stop"() : () -> ()
      %157 = vector.shape_cast %156 : vector<3x1x32xf32> to vector<3x32xf32>
      %c0_74 = arith.constant 0 : index
      %c0_75 = arith.constant 0 : index
      %158 = vector.load %arg16[%c0_74, %c0_75] : memref<3x32xf32, #tpu.memory_space<vmem>>, vector<3x32xf32>
      %159 = arith.addf %157, %158 : vector<3x32xf32>
      %c0_76 = arith.constant 0 : index
      %c0_77 = arith.constant 0 : index
      %160 = vector.load %arg17[%c0_76, %c0_77] : memref<3x32xf32, #tpu.memory_space<vmem>>, vector<3x32xf32>
      %c0_78 = arith.constant 0 : index
      %c0_79 = arith.constant 0 : index
      %161 = vector.load %arg18[%c0_78, %c0_79] : memref<3x32xf32, #tpu.memory_space<vmem>>, vector<3x32xf32>
      %cst_80 = arith.constant dense<0.000000e+00> : vector<3xf32>
      %162 = vector.multi_reduction <add>, %159, %cst_80 [1] : vector<3x32xf32> to vector<3xf32>
      %163 = vector.shape_cast %162 : vector<3xf32> to vector<3x1xf32>
      %cst_81 = arith.constant 3.200000e+01 : f32
      %164 = vector.broadcast %cst_81 : f32 to vector<3x1xf32>
      %165 = arith.divf %163, %164 : vector<3x1xf32>
      %166 = vector.broadcast %165 : vector<3x1xf32> to vector<3x32xf32>
      %167 = arith.subf %159, %166 : vector<3x32xf32>
      %168 = arith.mulf %167, %167 : vector<3x32xf32>
      %cst_82 = arith.constant dense<0.000000e+00> : vector<3xf32>
      %169 = vector.multi_reduction <add>, %168, %cst_82 [1] : vector<3x32xf32> to vector<3xf32>
      %170 = vector.shape_cast %169 : vector<3xf32> to vector<3x1xf32>
      %cst_83 = arith.constant 3.200000e+01 : f32
      %171 = vector.broadcast %cst_83 : f32 to vector<3x1xf32>
      %172 = arith.divf %170, %171 : vector<3x1xf32>
      %173 = vector.broadcast %165 : vector<3x1xf32> to vector<3x32xf32>
      %174 = arith.subf %159, %173 : vector<3x32xf32>
      %cst_84 = arith.constant 9.99999974E-6 : f32
      %175 = vector.broadcast %cst_84 : f32 to vector<3x1xf32>
      %176 = arith.addf %172, %175 : vector<3x1xf32>
      %177 = math.rsqrt %176 : vector<3x1xf32>
      %178 = vector.broadcast %177 : vector<3x1xf32> to vector<3x32xf32>
      %179 = arith.mulf %174, %178 : vector<3x32xf32>
      %180 = arith.mulf %179, %160 : vector<3x32xf32>
      %181 = arith.addf %180, %161 : vector<3x32xf32>
      %182 = tpu.iota {dimensions = array<i32: 0>} : vector<3x32xi32>
      %c0_i32_85 = arith.constant 0 : i32
      %183 = vector.broadcast %c0_i32_85 : i32 to vector<3x32xi32>
      %184 = arith.cmpi eq, %182, %183 : vector<3x32xi32>
      %cst_86 = arith.constant 2.000000e-02 : f32
      %185 = vector.broadcast %cst_86 : f32 to vector<3x32xf32>
      %186 = arith.mulf %185, %181 : vector<3x32xf32>
      %187 = arith.maximumf %181, %186 : vector<3x32xf32>
      %c1_i32_87 = arith.constant 1 : i32
      %188 = vector.broadcast %c1_i32_87 : i32 to vector<3x32xi32>
      %189 = arith.cmpi eq, %182, %188 : vector<3x32xi32>
      %cst_88 = arith.constant 0.000000e+00 : f32
      %190 = vector.broadcast %cst_88 : f32 to vector<3x32xf32>
      %191 = arith.maximumf %181, %190 : vector<3x32xf32>
      %192 = math.tanh %181 : vector<3x32xf32>
      %193 = arith.select %189, %191, %192 : vector<3x32xi1>, vector<3x32xf32>
      %194 = arith.select %184, %187, %193 : vector<3x32xi1>, vector<3x32xf32>
      %c0_89 = arith.constant 0 : index
      %c0_90 = arith.constant 0 : index
      %195 = vector.load %arg19[%c0_89, %c0_90] : memref<3x32xf32, #tpu.memory_space<vmem>>, vector<3x32xf32>
      %196 = arith.mulf %194, %195 : vector<3x32xf32>
      %cst_91 = arith.constant dense<0.000000e+00> : vector<3xf32>
      %197 = vector.multi_reduction <add>, %196, %cst_91 [1] : vector<3x32xf32> to vector<3xf32>
      %198 = vector.shape_cast %197 : vector<3xf32> to vector<3x1xf32>
      %c0_92 = arith.constant 0 : index
      %c0_93 = arith.constant 0 : index
      %199 = vector.load %arg20[%c0_92, %c0_93] : memref<3x1xf32, #tpu.memory_space<vmem>>, vector<3x1xf32>
      %200 = arith.addf %198, %199 : vector<3x1xf32>
      %201 = vector.extract_strided_slice %182 {offsets = [0, 0], sizes = [3, 1], strides = [1, 1]} : vector<3x32xi32> to vector<3x1xi32>
      %c0_i32_94 = arith.constant 0 : i32
      %202 = vector.broadcast %c0_i32_94 : i32 to vector<3x1xi32>
      %203 = arith.cmpi eq, %201, %202 : vector<3x1xi32>
      %cst_95 = arith.constant 2.000000e-02 : f32
      %204 = vector.broadcast %cst_95 : f32 to vector<3x1xf32>
      %205 = arith.mulf %204, %200 : vector<3x1xf32>
      %206 = arith.maximumf %200, %205 : vector<3x1xf32>
      %cst_96 = arith.constant 0.000000e+00 : f32
      %207 = vector.broadcast %cst_96 : f32 to vector<3x1xf32>
      %208 = arith.maximumf %200, %207 : vector<3x1xf32>
      %209 = arith.select %203, %206, %208 : vector<3x1xi1>, vector<3x1xf32>
      %210 = vector.shape_cast %209 : vector<3x1xf32> to vector<1x3x1xf32>
      %c0_97 = arith.constant 0 : index
      %c0_98 = arith.constant 0 : index
      %c0_99 = arith.constant 0 : index
      %211 = vector.load %arg23[%c0_97, %c0_98, %c0_99] : memref<1x3x1xf32, #tpu.memory_space<vmem>>, vector<1x3x1xf32>
      tpu.vector_store %arg23[%c0_97, %c0_98, %c0_99], %210 {strides = array<i32>} : memref<1x3x1xf32, #tpu.memory_space<vmem>>, vector<1x3x1xf32>,
    } else {
    }
    return
  }
  func.func @transform_0(%arg0: i32, %arg1: i32) -> (i32, i32, i32) {
    %c0_i32 = arith.constant 0 : i32
    %c0_i32_0 = arith.constant 0 : i32
    %c0_i32_1 = arith.constant 0 : i32
    return %arg0, %c0_i32, %c0_i32_0 : i32, i32, i32
  }
  func.func @transform_1(%arg0: i32, %arg1: i32) -> (i32, i32, i32) {
    %c0_i32 = arith.constant 0 : i32
    %c0_i32_0 = arith.constant 0 : i32
    %c0_i32_1 = arith.constant 0 : i32
    return %arg1, %c0_i32, %c0_i32_0 : i32, i32, i32
  }
  func.func @transform_2(%arg0: i32, %arg1: i32) -> (i32, i32, i32) {
    %c0_i32 = arith.constant 0 : i32
    %c0_i32_0 = arith.constant 0 : i32
    %c0_i32_1 = arith.constant 0 : i32
    return %arg1, %c0_i32, %c0_i32_0 : i32, i32, i32
  }
  func.func @transform_3(%arg0: i32, %arg1: i32) -> (i32, i32, i32) {
    %c0_i32 = arith.constant 0 : i32
    %c0_i32_0 = arith.constant 0 : i32
    %c0_i32_1 = arith.constant 0 : i32
    return %arg1, %c0_i32, %c0_i32_0 : i32, i32, i32
  }
  func.func @transform_4(%arg0: i32, %arg1: i32) -> (i32, i32, i32) {
    %c0_i32 = arith.constant 0 : i32
    %c0_i32_0 = arith.constant 0 : i32
    %c0_i32_1 = arith.constant 0 : i32
    return %arg1, %c0_i32, %c0_i32_0 : i32, i32, i32
  }
  func.func @transform_5(%arg0: i32, %arg1: i32) -> (i32, i32, i32) {
    %c0_i32 = arith.constant 0 : i32
    %c0_i32_0 = arith.constant 0 : i32
    %c0_i32_1 = arith.constant 0 : i32
    return %arg1, %c0_i32, %c0_i32_0 : i32, i32, i32
  }
  func.func @transform_6(%arg0: i32, %arg1: i32) -> (i32, i32, i32) {
    %c0_i32 = arith.constant 0 : i32
    %c0_i32_0 = arith.constant 0 : i32
    %c0_i32_1 = arith.constant 0 : i32
    return %arg1, %c0_i32, %c0_i32_0 : i32, i32, i32
  }
  func.func @transform_7(%arg0: i32, %arg1: i32) -> (i32, i32, i32) {
    %c0_i32 = arith.constant 0 : i32
    %c0_i32_0 = arith.constant 0 : i32
    %c0_i32_1 = arith.constant 0 : i32
    return %arg1, %c0_i32, %c0_i32_0 : i32, i32, i32
  }
  func.func @transform_8(%arg0: i32, %arg1: i32) -> (i32, i32, i32) {
    %c0_i32 = arith.constant 0 : i32
    %c0_i32_0 = arith.constant 0 : i32
    %c0_i32_1 = arith.constant 0 : i32
    return %arg1, %c0_i32, %c0_i32_0 : i32, i32, i32
  }
  func.func @transform_9(%arg0: i32, %arg1: i32) -> (i32, i32, i32) {
    %c0_i32 = arith.constant 0 : i32
    %c0_i32_0 = arith.constant 0 : i32
    %c0_i32_1 = arith.constant 0 : i32
    return %arg1, %c0_i32, %c0_i32_0 : i32, i32, i32
  }
  func.func @transform_10(%arg0: i32, %arg1: i32) -> (i32, i32, i32) {
    %c0_i32 = arith.constant 0 : i32
    %c0_i32_0 = arith.constant 0 : i32
    %c0_i32_1 = arith.constant 0 : i32
    return %arg1, %c0_i32, %c0_i32_0 : i32, i32, i32
  }
  func.func @transform_11(%arg0: i32, %arg1: i32) -> (i32, i32, i32) {
    %c0_i32 = arith.constant 0 : i32
    %c0_i32_0 = arith.constant 0 : i32
    %c0_i32_1 = arith.constant 0 : i32
    return %arg1, %c0_i32, %c0_i32_0 : i32, i32, i32
  }
  func.func @transform_12(%arg0: i32, %arg1: i32) -> (i32, i32, i32) {
    %c0_i32 = arith.constant 0 : i32
    %c0_i32_0 = arith.constant 0 : i32
    %c0_i32_1 = arith.constant 0 : i32
    return %arg1, %c0_i32, %c0_i32_0 : i32, i32, i32
  }
  func.func @transform_13(%arg0: i32, %arg1: i32) -> (i32, i32, i32) {
    %c0_i32 = arith.constant 0 : i32
    %c0_i32_0 = arith.constant 0 : i32
    %c0_i32_1 = arith.constant 0 : i32
    %c0_i32_2 = arith.constant 0 : i32
    return %c0_i32, %c0_i32_0, %c0_i32_1 : i32, i32, i32
  }
  func.func @transform_14(%arg0: i32, %arg1: i32) -> (i32, i32) {
    %c0_i32 = arith.constant 0 : i32
    %c0_i32_0 = arith.constant 0 : i32
    %c0_i32_1 = arith.constant 0 : i32
    return %c0_i32, %c0_i32_0 : i32, i32
  }
  func.func @transform_15(%arg0: i32, %arg1: i32) -> (i32, i32) {
    %c0_i32 = arith.constant 0 : i32
    %c0_i32_0 = arith.constant 0 : i32
    %c0_i32_1 = arith.constant 0 : i32
    return %c0_i32, %c0_i32_0 : i32, i32
  }
  func.func @transform_16(%arg0: i32, %arg1: i32) -> (i32, i32) {
    %c0_i32 = arith.constant 0 : i32
    %c0_i32_0 = arith.constant 0 : i32
    %c0_i32_1 = arith.constant 0 : i32
    return %c0_i32, %c0_i32_0 : i32, i32
  }
  func.func @transform_17(%arg0: i32, %arg1: i32) -> (i32, i32) {
    %c0_i32 = arith.constant 0 : i32
    %c0_i32_0 = arith.constant 0 : i32
    %c0_i32_1 = arith.constant 0 : i32
    return %c0_i32, %c0_i32_0 : i32, i32
  }
  func.func @transform_18(%arg0: i32, %arg1: i32) -> (i32, i32) {
    %c0_i32 = arith.constant 0 : i32
    %c0_i32_0 = arith.constant 0 : i32
    %c0_i32_1 = arith.constant 0 : i32
    return %c0_i32, %c0_i32_0 : i32, i32
  }
  func.func @transform_19(%arg0: i32, %arg1: i32) -> (i32, i32, i32) {
    %c0_i32 = arith.constant 0 : i32
    %c0_i32_0 = arith.constant 0 : i32
    %c0_i32_1 = arith.constant 0 : i32
    return %arg0, %c0_i32, %c0_i32_0 : i32, i32, i32
  }
  func.func @transform_20(%arg0: i32, %arg1: i32) -> (i32, i32, i32, i32) {
    %c0_i32 = arith.constant 0 : i32
    %c0_i32_0 = arith.constant 0 : i32
    %c0_i32_1 = arith.constant 0 : i32
    %c0_i32_2 = arith.constant 0 : i32
    return %arg0, %c0_i32, %c0_i32_0, %c0_i32_1 : i32, i32, i32, i32
  }
  func.func @transform_21(%arg0: i32, %arg1: i32) -> (i32, i32, i32) {
    %c0_i32 = arith.constant 0 : i32
    %c0_i32_0 = arith.constant 0 : i32
    %c0_i32_1 = arith.constant 0 : i32
    return %arg0, %c0_i32, %c0_i32_0 : i32, i32, i32
  }
}

</mosaic_0001>

<bundles_post_ra>
// kernel: tpu_custom_call.1
= control target key start
LH: loop header
LB: loop body
LE: loop exit
PB: predicated region body
PF: predicated region fallthrough
CT: control target
= control target key end

     0   :  { %s4490_s0 = inlined_call_operand.vmem [shape: f32[2,8,32], index: 0, kind: input, shape index: {}]   ;;  %s4491_s1 = inlined_call_operand.vmem [shape: bf16[2,32,96], index: 1, kind: input, shape index: {}]   ;;  %s4492_s2 = inlined_call_operand.vmem [shape: f32[2,1,96], index: 2, kind: input, shape index: {}]   ;;  %s4493_s3 = inlined_call_operand.hbm [shape: bf16[2,32,32], index: 3, kind: input, shape index: {}]   ;;  %s4494_s4 = inlined_call_operand.hbm [shape: f32[2,1,32], index: 4, kind: input, shape index: {}]   ;;  %s4495_s5 = inlined_call_operand.hbm [shape: f32[2,1,32], index: 5, kind: input, shape index: {}]   ;;  %s4496_s6 = inlined_call_operand.hbm [shape: f32[2,1,32], index: 6, kind: input, shape index: {}]   ;;  %s4497_s7 = inlined_call_operand.hbm [shape: bf16[2,32,64], index: 7, kind: input, shape index: {}]   ;;  %s4498_s8 = inlined_call_operand.hbm [shape: f32[2,1,64], index: 8, kind: input, shape index: {}]   ;;  %s4499_s9 = inlined_call_operand.vmem [shape: bf16[2,64,32], index: 9, kind: input, shape index: {}]   ;;  %s4500_s10 = inlined_call_operand.hbm [shape: f32[2,1,32], index: 10, kind: input, shape index: {}]   ;;  %s4501_s11 = inlined_call_operand.hbm [shape: f32[2,1,32], index: 11, kind: input, shape index: {}]   ;;  %s4502_s12 = inlined_call_operand.hbm [shape: f32[2,1,32], index: 12, kind: input, shape index: {}]   ;;  %s4503_s13 = inlined_call_operand.vmem [shape: bf16[3,32,32], index: 13, kind: input, shape index: {}]   ;;  %s4504_s14 = inlined_call_operand.vmem [shape: f32[3,32], index: 14, kind: input, shape index: {}]   ;;  %s4505_s15 = inlined_call_operand.vmem [shape: f32[3,32], index: 15, kind: input, shape index: {}]   ;;  %s4506_s16 = inlined_call_operand.vmem [shape: f32[3,32], index: 16, kind: input, shape index: {}]   ;;  %s4507_s17 = inlined_call_operand.vmem [shape: f32[3,32], index: 17, kind: input, shape index: {}]   ;;  %s4508_s18 = inlined_call_operand.vmem [shape: f32[3,1], index: 18, kind: input, shape index: {}]   ;;  %s4509_s19 = inlined_call_operand.hbm [shape: f32[2,8,32], index: 19, kind: output, shape index: {0}]   ;;  %s4510_s20 = inlined_call_operand.hbm [shape: f32[2,4,8,8], index: 20, kind: output, shape index: {1}]   ;;  %s4511_s21 = inlined_call_operand.vmem [shape: f32[2,3,1], index: 21, kind: output, shape index: {2}]  }
   0x1   :  { %4544 = sst [smem:[#allocation43_spill]] %s4490_s0 }
   0x2   :  { %4545 = sst [smem:[#allocation44_spill]] %s4491_s1 }
   0x3   :  { %4546 = sst [smem:[#allocation45_spill]] %s4492_s2 }
   0x4   :  { %4547 = sst [smem:[#allocation46_spill]] %s4493_s3 }
   0x5   :  { %4548 = sst [smem:[#allocation47_spill]] %s4494_s4 }
   0x6   :  { %4549 = sst [smem:[#allocation48_spill]] %s4495_s5 }
   0x7   :  { %4550 = sst [smem:[#allocation49_spill]] %s4496_s6 }
   0x8   :  { %4551 = sst [smem:[#allocation50_spill]] %s4497_s7 }
   0x9   :  { %4552 = sst [smem:[#allocation51_spill]] %s4498_s8 }
   0xa   :  { %4553 = sst [smem:[#allocation52_spill]] %s4499_s9 }
   0xb   :  { %4554 = sst [smem:[#allocation53_spill]] %s4500_s10 }
   0xc   :  { %4555 = sst [smem:[#allocation54_spill]] %s4501_s11 }
   0xd   :  { %4556 = sst [smem:[#allocation55_spill]] %s4502_s12 }
   0xe   :  { %4557 = sst [smem:[#allocation56_spill]] %s4503_s13 }
   0xf   :  { %4558 = sst [smem:[#allocation57_spill]] %s4504_s14 }
  0x10   :  { %4559 = sst [smem:[#allocation58_spill]] %s4505_s15 }
  0x11   :  { %4560 = sst [smem:[#allocation59_spill]] %s4506_s16 }
  0x12   :  { %4561 = sst [smem:[#allocation60_spill]] %s4507_s17 }
  0x13   :  { %4562 = sst [smem:[#allocation61_spill]] %s4508_s18 }
  0x14   :  { %4563 = sst [smem:[#allocation62_spill]] %s4509_s19 }
  0x15   :  { %4564 = sst [smem:[#allocation63_spill]] %s4510_s20 }
  0x16   :  { %4565 = sst [smem:[#allocation64_spill]] %s4511_s21 }
  0x17   :  { %27 = vsyncpa [#allocation3], 0 }
  0x18   :  { %29 = vsyncpa [#allocation3 + $0x1], 0 }
  0x19   :  { %30 = vsyncpa [#allocation6], 0 }
  0x1a   :  { %32 = vsyncpa [#allocation6 + $0x1], 0 }
  0x1b   :  { %33 = vsyncpa [#allocation9], 0 }
  0x1c   :  { %35 = vsyncpa [#allocation9 + $0x1], 0 }
  0x1d   :  { %36 = vsyncpa [#allocation12], 0 }
  0x1e   :  { %38 = vsyncpa [#allocation12 + $0x1], 0 }
  0x1f   :  { %39 = vsyncpa [#allocation15], 0 }
  0x20   :  { %41 = vsyncpa [#allocation15 + $0x1], 0 }
  0x21   :  { %42 = vsyncpa [#allocation4], 0 }
  0x22   :  { %44 = vsyncpa [#allocation4 + $0x1], 0 }
  0x23   :  { %45 = vsyncpa [#allocation19], 0 }
  0x24   :  { %47 = vsyncpa [#allocation19 + $0x1], 0  ;;  %s3664_s2 = smov 0   ;;  %s3666_s25 = smov 0  }
  0x25   :  { %s3668_s26 = smov 0   ;;  %s3670_s27 = smov 0  }
  0x26   :  { %s3672_s3 = smov 0   ;;  %s3674_s28 = smov 0  }
  0x27   :  { %s3676_s29 = smov 0   ;;  %s3678_s0 = smov 0  }
  0x28   :  { %s3680_s4 = smov 0   ;;  %s3682_s30 = smov 0  }
  0x29   :  { %s3684_s5 = smov 0  }
  0x2a LB: > { %4566 = sst [smem:[#allocation27_spill]] %s3489_s2  ;;  %s3718_s22 = sadd.s32 4294967295, %s3529_s5   ;;  %s3529_s5 = sphi %s3684_s5, %s53_s5   ;;  %s3525_s30 = sphi %s3682_s30, %s4657_s30   ;;  %s3521_s4 = sphi %s3680_s4, %s4656_s4   ;;  %s3517_s0 = sphi %s3678_s0, %s4655_s0   ;;  %s3513_s29 = sphi %s3676_s29, %s4654_s29   ;;  %s3509_s28 = sphi %s3674_s28, %s4653_s28   ;;  %s3505_s3 = sphi %s3672_s3, %s4652_s3   ;;  %s3501_s27 = sphi %s3670_s27, %s4651_s27   ;;  %s3497_s26 = sphi %s3668_s26, %s4650_s26   ;;  %s3493_s25 = sphi %s3666_s25, %s4649_s25   ;;  %s3489_s2 = sphi %s3664_s2, %s4648_s2  }
  0x2b   : > { %4567 = sst [smem:[#allocation28_spill]] %s3493_s25  ;;  %s2658_s23 = sadd.s32 4294967294, %s3529_s5  }
  0x2c   : > { %4568 = sst [smem:[#allocation29_spill]] %s3497_s26  ;;  %s62_s1 = sadd.s32 1, %s3521_s4 }
  0x2d   : > { %4569 = sst [smem:[#allocation30_spill]] %s3505_s3  ;;  %s65_s24 = sadd.s32 1, %s3525_s30 }
  0x2e   : > { %4570 = sst [smem:[#allocation31_spill]] %s3509_s28  ;;  %p63_p0 = scmp.ge.s32.totalorder %s62_s1, 2 }
  0x2f   : > { %4571 = sst [smem:[#allocation32_spill]] %s3513_s29  ;;  %s150_s20 = sadd.s32 1, %s3509_s28 }
  0x30   : > { %4572 = sst [smem:[#allocation33_spill]] %s3521_s4  ;;  %p157_p1 = scmp.ne.s32.totalorder %s3509_s28, %s3505_s3 }
  0x31   : > { %4573 = sst [smem:[#allocation34_spill]] %s3525_s30  ;;  %p158_p2 = scmp.eq.s32.totalorder %s3529_s5, 0 }
  0x32   : > { %4574 = sst [smem:[#allocation35_spill]] %s3529_s5  ;;  %s4659_s1 = smov (%p63_p0, %s62_s1), 0 }
  0x33   : > { %4575 = sst [smem:[#allocation36_spill]] %s4659_s1  ;;  %s4661_s24 = smov (!%p63_p0, %s65_s24), %s3525_s30 }
  0x34   : > { %s147_s19 = ssub.s32 %s3521_s4, %s4659_s1  ;;  %p3732_p3 = por %p158_p2, %p157_p1 }
  0x35   : > { %p67_p4 = scmp.ge.s32.totalorder %s4661_s24, 2  ;;  %p148_p5 = scmp.eq.s32.totalorder %s147_s19, 0 }
  0x36   : > { %p163_p6 = scmp.ne.s32.totalorder %s3505_s3, %s3501_s27  ;;  %p164_p7 = scmp.eq.s32.totalorder %s3718_s22, 0 }
  0x37   : > { %s4663_s24 = smov (%p67_p4, %s4661_s24), 0  ;;  %s536_s15 = sadd.s32 1, %s3497_s26 }
  0x38   : > { %4577 = sst [smem:[#allocation37_spill]] %s4663_s24  ;;  %p3743_p8 = por %p164_p7, %p163_p6 }
  0x39   : > { %s3741_s17 = scalar_select %p148_p5, %s3509_s28, %s150_s20  }
  0x3a   : > { %s4579_s1 = scalar_select %p3743_p8, 1, 0 }
  0x3b   : > { %4578 = sst [smem:[#allocation38_spill]] %s3741_s17  ;;  %s533_s16 = ssub.s32 %s3525_s30, %s4663_s24 }
  0x3c   : > { %p534_p9 = scmp.eq.s32.totalorder %s533_s16, 0  ;;  %p546_p10 = scmp.ne.s32.totalorder %s3497_s26, %s3493_s25 }
  0x3d   : > { %p547_p11 = scmp.eq.s32.totalorder %s3718_s22, 3  ;;  %p552_p13 = scmp.ne.s32.totalorder %s3493_s25, %s3489_s2 }
  0x3e   : > { %s3754_s19 = scalar_select %p534_p9, %s3497_s26, %s536_s15  }
  0x3f   : > { %p3756_p12 = por %p547_p11, %p546_p10  ;;  %p553_p0 = scmp.eq.s32.totalorder %s2658_s23, 3 }
  0x40   : > { %4580 = sst [smem:[#allocation39_spill]] %s3754_s19  ;;  %p2943_p1 = scmp.lt.s32.totalorder %s3529_s5, 4 }
  0x41   : > { %s4581_s27 = scalar_select %p3756_p12, 1, 0 }
  0x42   : > { %s3764_s20 = sand.u32 1, %s3509_s28   ;;  %p3766_p2 = por %p553_p0, %p552_p13 }
  0x43   : > { %4582 = sst [smem:[#allocation40_spill]] %s4581_s27  ;;  %s3771_s16 = sand.u32 1, %s3529_s5  }
  0x44   : > { %s4583_s24 = scalar_select %p3766_p2, 1, 0 }
  0x45   : > { %p3775_p4 = pnand %p2943_p1, %p3732_p3  ;;  %s3780_s30 = sshll.u32 %s3521_s4, 4 }
  0x46   : > { %4584 = sst [smem:[#allocation41_spill]] %s4583_s24  ;;  %s688_s24 = scalar_lea.vmem [#allocation5], %s3764_s20 }
  0x47   : > { %s4585_s15 = scalar_select %p3775_p4, 1, 0 }
  0x48   : > { %s4586_s28 = sld [smem:[#allocation47_spill]]  ;;  %s695_s18 = sshll.u32 %s688_s24, 4  ;;  %s3790_s18 = int_to_ptr.vmem [resolvable:$true] %s695_s18 }
  0x49   : > { %p3798_p7 = pneg %p3775_p4 }
  0x4e   : > { %s4587_s19 = smov %s4586_s28  ;;  %s3786_s26 = scalar_lea.hbm %s4586_s28, %s3780_s30 }
  0x4f   : > { %s3089_s27 = scalar_lea.hbm %s3786_s26, 16  ;;  %s3094_s24 = scalar_lea.hbm %s4587_s19, 32 }
  0x50   : > { %p3090_p6 = scmp.ne.s32.totalorder %s3786_s26, %s3089_s27  ;;  %p3095_p11 = scmp.lt.u32.totalorder %s3786_s26, %s4587_s19 }
  0x51   : > { %p3096_p13 = scmp.lt.u32.totalorder %s3094_s24, %s3089_s27  ;;  %p3098_p1 = scmp.lt.u32.totalorder %s3089_s27, %s3786_s26 }
  0x52   : > { %p3092_p9 = pnand %p3798_p7, %p3090_p6 }
  0x53   : > { %p3097_p0 = por %p3096_p13, %p3095_p11 }
  0x54   : > { %p3093_p10 = pneg %p3092_p9 }
  0x55   : > { %p3099_p5 = por %p3098_p1, %p3097_p0 }
  0x57   : > { %p3100_p3 = pnand %p3099_p5, %p3093_p10 }
  0x59   : > { %3103 = shalt.err (!%p3100_p3)
}
  0x5a   : > { %s3104_s2 = scalar_lea.vmem %s3790_s18, 16  ;;  %s3531_s17 = smov [#allocation5]  }
  0x5b   : > { %p3105_p6 = scmp.ne.s32.totalorder %s3790_s18, %s3104_s2  ;;  %s3109_s28 = sshll.u32 %s3531_s17, 4  ;;  %s3110_s28 = int_to_ptr.vmem [resolvable:$false] %s3109_s28 }
  0x5c   : > { %s3111_s13 = scalar_lea.vmem %s3110_s28, 32  ;;  %p3112_p12 = scmp.lt.s32.totalorder %s3790_s18, %s3110_s28 }
  0x5d   : > { %p3107_p9 = pnand %p3105_p6, %p3798_p7  ;;  %p3113_p8 = scmp.lt.s32.totalorder %s3111_s13, %s3104_s2 }
  0x5f   : > { %p3108_p2 = pneg %p3107_p9  ;;  %p3114_p11 = por %p3113_p8, %p3112_p12 }
  0x61   : > { %p3115_p13 = pnand %p3114_p11, %p3108_p2 }
  0x63   : > { %3118 = shalt.err (!%p3115_p13)
}
  0x64   : > { %s4589_s27 = scalar_lea.sflag [#allocation6], %s3771_s16  ;;  %p4590_p5 = scmp.lt.s32.totalorder %s3529_s5, 5 }
  0x65   : > { %2914 = dma.hbm_to_vmem [thread:$0]  (!%p3775_p4), %s3786_s26, 16, %s3790_s18, %s4589_s27  }
  0x66   : > { %p4591_p3 = scmp.ge.s32.totalorder %s3529_s5, 1  ;;  %s4593_s6 = sld [smem:[#allocation49_spill]] }
  0x67   : > { %s722_s28 = scalar_lea.vmem [#allocation8], %s3764_s20 }
  0x68   : > { %p3827_p10 = pnand %p4591_p3, %p4590_p5  ;;  %s729_s13 = sshll.u32 %s722_s28, 4  ;;  %s730_s13 = int_to_ptr.vmem [resolvable:$true] %s729_s13 }
  0x6a   : > { %s4592_s2 = scalar_select %p3827_p10, 1, 0 }
  0x6c   : > { %s3835_s17 = scalar_lea.hbm %s4593_s6, %s3780_s30  ;;  %s3124_s5 = scalar_lea.hbm %s4593_s6, 32 }
  0x6d   : > { %s3119_s26 = scalar_lea.hbm %s3835_s17, 16  ;;  %p3125_p0 = scmp.lt.u32.totalorder %s3835_s17, %s4593_s6 }
  0x6e   : > { %p3120_p8 = scmp.ne.s32.totalorder %s3835_s17, %s3119_s26  ;;  %p3126_p1 = scmp.lt.u32.totalorder %s3124_s5, %s3119_s26 }
  0x6f   : > { %p3128_p9 = scmp.lt.u32.totalorder %s3119_s26, %s3835_s17 }
  0x70   : > { %p3122_p12 = pnand %p3120_p8, %p3798_p7  ;;  %p3127_p6 = por %p3126_p1, %p3125_p0 }
  0x72   : > { %p3123_p2 = pneg %p3122_p12  ;;  %p3129_p11 = por %p3128_p9, %p3127_p6 }
  0x74   : > { %p3130_p13 = pnand %p3129_p11, %p3123_p2 }
  0x76   : > { %3133 = shalt.err (!%p3130_p13)
}
  0x77   : > { %s3134_s28 = scalar_lea.vmem %s730_s13, 16  ;;  %s3532_s19 = smov [#allocation8]  }
  0x78   : > { %p3135_p5 = scmp.ne.s32.totalorder %s730_s13, %s3134_s28  ;;  %s3139_s9 = sshll.u32 %s3532_s19, 4  ;;  %s3140_s9 = int_to_ptr.vmem [resolvable:$false] %s3139_s9 }
  0x79   : > { %s3141_s18 = scalar_lea.vmem %s3140_s9, 32  ;;  %p3142_p12 = scmp.lt.s32.totalorder %s730_s13, %s3140_s9 }
  0x7a   : > { %p3137_p3 = pnand %p3135_p5, %p3798_p7  ;;  %p3143_p10 = scmp.lt.s32.totalorder %s3141_s18, %s3134_s28 }
  0x7c   : > { %p3138_p8 = pneg %p3137_p3  ;;  %p3144_p4 = por %p3143_p10, %p3142_p12 }
  0x7e   : > { %p3145_p0 = pnand %p3144_p4, %p3138_p8 }
  0x80   : > { %3148 = shalt.err (!%p3145_p0)
}
  0x81   : > { %p4594_p1 = scmp.ne.s32.totalorder %s4585_s15, 0  ;;  %s4595_s5 = scalar_lea.sflag [#allocation9], %s3771_s16 }
  0x82   : > { %s4596_s8 = sld [smem:[#allocation51_spill]]  ;;  %s760_s9 = scalar_lea.vmem [#allocation11], %s3764_s20 }
  0x83   : > { %2920 = dma.hbm_to_vmem [thread:$0]  (!%p4594_p1), %s3835_s17, 16, %s730_s13, %s4595_s5  }
  0x84   : > { %s767_s24 = sshll.u32 %s760_s9, 4  ;;  %s768_s24 = int_to_ptr.vmem [resolvable:$true] %s767_s24 }
  0x88   : > { %s3862_s19 = scalar_lea.hbm %s4596_s8, %s3780_s30  ;;  %s3154_s13 = scalar_lea.hbm %s4596_s8, 32 }
  0x89   : > { %s3149_s28 = scalar_lea.hbm %s3862_s19, 16  ;;  %p3155_p6 = scmp.lt.u32.totalorder %s3862_s19, %s4596_s8 }
  0x8a   : > { %p3150_p4 = scmp.ne.s32.totalorder %s3862_s19, %s3149_s28  ;;  %p3156_p9 = scmp.lt.u32.totalorder %s3154_s13, %s3149_s28 }
  0x8b   : > { %p3158_p13 = scmp.lt.u32.totalorder %s3149_s28, %s3862_s19 }
  0x8c   : > { %p3152_p10 = pnand %p3150_p4, %p3798_p7  ;;  %p3157_p11 = por %p3156_p9, %p3155_p6 }
  0x8e   : > { %p3153_p2 = pneg %p3152_p10  ;;  %p3159_p5 = por %p3158_p13, %p3157_p11 }
  0x90   : > { %p3160_p3 = pnand %p3159_p5, %p3153_p2 }
  0x92   : > { %3163 = shalt.err (!%p3160_p3)
}
  0x93   : > { %s3164_s27 = scalar_lea.vmem %s768_s24, 16  ;;  %s3533_s9 = smov [#allocation11]  }
  0x94   : > { %p3165_p8 = scmp.ne.s32.totalorder %s768_s24, %s3164_s27  ;;  %s3169_s23 = sshll.u32 %s3533_s9, 4  ;;  %s3170_s23 = int_to_ptr.vmem [resolvable:$false] %s3169_s23 }
  0x95   : > { %s3171_s18 = scalar_lea.vmem %s3170_s23, 32  ;;  %p3172_p4 = scmp.lt.s32.totalorder %s768_s24, %s3170_s23 }
  0x96   : > { %p3167_p12 = pnand %p3165_p8, %p3798_p7  ;;  %p3173_p10 = scmp.lt.s32.totalorder %s3171_s18, %s3164_s27 }
  0x98   : > { %p3168_p0 = pneg %p3167_p12  ;;  %p3174_p1 = por %p3173_p10, %p3172_p4 }
  0x9a   : > { %p3175_p6 = pnand %p3174_p1, %p3168_p0 }
  0x9c   : > { %3178 = shalt.err (!%p3175_p6)
}
  0x9d   : > { %p4597_p9 = scmp.ne.s32.totalorder %s4585_s15, 0  ;;  %s4598_s28 = scalar_lea.sflag [#allocation12], %s3771_s16 }
  0x9e   : > { %s4599_s11 = sld [smem:[#allocation54_spill]]  ;;  %s802_s23 = scalar_lea.vmem [#allocation14], %s3764_s20 }
  0x9f   : > { %2926 = dma.hbm_to_vmem [thread:$0]  (!%p4597_p9), %s3862_s19, 16, %s768_s24, %s4598_s28  }
  0xa0   : > { %s809_s26 = sshll.u32 %s802_s23, 4  ;;  %s810_s26 = int_to_ptr.vmem [resolvable:$true] %s809_s26 }
  0xa4   : > { %s3889_s5 = scalar_lea.hbm %s4599_s11, %s3780_s30  ;;  %s3184_s24 = scalar_lea.hbm %s4599_s11, 32 }
  0xa5   : > { %s3179_s9 = scalar_lea.hbm %s3889_s5, 16  ;;  %p3185_p13 = scmp.lt.u32.totalorder %s3889_s5, %s4599_s11 }
  0xa6   : > { %p3180_p1 = scmp.ne.s32.totalorder %s3889_s5, %s3179_s9  ;;  %p3186_p5 = scmp.lt.u32.totalorder %s3184_s24, %s3179_s9 }
  0xa7   : > { %p3188_p8 = scmp.lt.u32.totalorder %s3179_s9, %s3889_s5 }
  0xa8   : > { %p3182_p2 = pnand %p3180_p1, %p3798_p7  ;;  %p3187_p3 = por %p3186_p5, %p3185_p13 }
  0xaa   : > { %p3183_p11 = pneg %p3182_p2  ;;  %p3189_p12 = por %p3188_p8, %p3187_p3 }
  0xac   : > { %p3190_p0 = pnand %p3189_p12, %p3183_p11 }
  0xae   : > { %3193 = shalt.err (!%p3190_p0)
}
  0xaf   : > { %s3194_s13 = scalar_lea.vmem %s810_s26, 16  ;;  %s3534_s23 = smov [#allocation14]  }
  0xb0   : > { %p3195_p4 = scmp.ne.s32.totalorder %s810_s26, %s3194_s13  ;;  %s3199_s27 = sshll.u32 %s3534_s23, 4  ;;  %s3200_s27 = int_to_ptr.vmem [resolvable:$false] %s3199_s27 }
  0xb1   : > { %s3201_s18 = scalar_lea.vmem %s3200_s27, 32  ;;  %p3202_p1 = scmp.lt.s32.totalorder %s810_s26, %s3200_s27 }
  0xb2   : > { %p3197_p10 = pnand %p3195_p4, %p3798_p7  ;;  %p3203_p2 = scmp.lt.s32.totalorder %s3201_s18, %s3194_s13 }
  0xb4   : > { %p3198_p6 = pneg %p3197_p10  ;;  %p3204_p9 = por %p3203_p2, %p3202_p1 }
  0xb6   : > { %p3205_p5 = pnand %p3204_p9, %p3198_p6 }
  0xb8   : > { %3208 = shalt.err (!%p3205_p5)
}
  0xb9   : > { %p4600_p13 = scmp.ne.s32.totalorder %s4585_s15, 0  ;;  %s4601_s9 = scalar_lea.sflag [#allocation15], %s3771_s16 }
  0xba   : > { %s2661_s19 = sshll.u32 %s3764_s20, 4  ;;  %s2734_s24 = sshll.u32 %s3521_s4, 8 }
  0xbb   : > { %2932 = dma.hbm_to_vmem [thread:$0]  (!%p4600_p13), %s3889_s5, 16, %s810_s26, %s4601_s9  }
  0xbc   : > { %s4602_s17 = sld [smem:[#allocation46_spill]]  ;;  %s668_s23 = scalar_lea.vmem [#allocation2], %s2661_s19 }
  0xbd   : > { %s675_s18 = sshll.u32 %s668_s23, 4  ;;  %s665_s6 = scalar_lea.sflag [#allocation3], %s3764_s20  ;;  %s3923_s18 = int_to_ptr.vmem [resolvable:$true] %s675_s18 }
  0xc2   : > { %s3919_s13 = scalar_lea.hbm %s4602_s17, %s2734_s24  ;;  %s3214_s9 = scalar_lea.hbm %s4602_s17, 512 }
  0xc3   : > { %s3209_s8 = scalar_lea.hbm %s3919_s13, 256  ;;  %p3215_p8 = scmp.lt.u32.totalorder %s3919_s13, %s4602_s17 }
  0xc4   : > { %p3210_p9 = scmp.ne.s32.totalorder %s3919_s13, %s3209_s8  ;;  %p3216_p12 = scmp.lt.u32.totalorder %s3214_s9, %s3209_s8 }
  0xc5   : > { %p3218_p4 = scmp.lt.u32.totalorder %s3209_s8, %s3919_s13 }
  0xc6   : > { %p3212_p11 = pnand %p3210_p9, %p3798_p7  ;;  %p3217_p0 = por %p3216_p12, %p3215_p8 }
  0xc8   : > { %p3213_p3 = pneg %p3212_p11  ;;  %p3219_p10 = por %p3218_p4, %p3217_p0 }
  0xca   : > { %p3220_p6 = pnand %p3219_p10, %p3213_p3 }
  0xcc   : > { %3223 = shalt.err (!%p3220_p6)
}
  0xcd   : > { %s3224_s23 = scalar_lea.vmem %s3923_s18, 256  ;;  %s3535_s5 = smov [#allocation2]  }
  0xce   : > { %p3225_p1 = scmp.ne.s32.totalorder %s3923_s18, %s3224_s23  ;;  %s3229_s26 = sshll.u32 %s3535_s5, 4  ;;  %s3230_s26 = int_to_ptr.vmem [resolvable:$false] %s3229_s26 }
  0xcf   : > { %s3231_s27 = scalar_lea.vmem %s3230_s26, 512  ;;  %p3232_p9 = scmp.lt.s32.totalorder %s3923_s18, %s3230_s26 }
  0xd0   : > { %p3227_p2 = pnand %p3225_p1, %p3798_p7  ;;  %p3233_p11 = scmp.lt.s32.totalorder %s3231_s27, %s3224_s23 }
  0xd2   : > { %p3228_p5 = pneg %p3227_p2  ;;  %p3234_p8 = por %p3233_p11, %p3232_p9 }
  0xd4   : > { %p3235_p12 = pnand %p3234_p8, %p3228_p5 }
  0xd6   : > { %3238 = shalt.err (!%p3235_p12)
}
  0xd7   : > { %s3536_s8 = smov 64   ;;  %s3537_s9 = smov 4  }
  0xd8   : > { %2911 = dma.hbm_to_vmem [thread:$0]  (!%p4600_p13), %s3919_s13, 256, %s3923_s18, %s665_s6, %s3536_s8, %s3536_s8, %s3537_s9  }
  0xd9   : > { %s4603_s7 = sld [smem:[#allocation50_spill]]  ;;  %s740_s26 = scalar_lea.vmem [#allocation10], %s2661_s19 }
  0xda   : > { %s747_s27 = sshll.u32 %s740_s26, 4  ;;  %s4604_s21 = sld [smem:[#allocation48_spill]]  ;;  %s3961_s27 = int_to_ptr.vmem [resolvable:$true] %s747_s27 }
  0xdb   : > { %s705_s6 = scalar_lea.vmem [#allocation7], %s3764_s20 }
  0xdc   : > { %s712_s13 = sshll.u32 %s705_s6, 4  ;;  %s713_s13 = int_to_ptr.vmem [resolvable:$true] %s712_s13 }
  0xdf   : > { %s3957_s5 = scalar_lea.hbm %s4603_s7, %s2734_s24 }
  0xe0   : > { %s3967_s29 = scalar_lea.hbm %s4604_s21, %s3780_s30  ;;  %s3244_s28 = scalar_lea.hbm %s4604_s21, 32 }
  0xe1   : > { %s3239_s18 = scalar_lea.hbm %s3967_s29, 16  ;;  %p3245_p10 = scmp.lt.u32.totalorder %s3967_s29, %s4604_s21 }
  0xe2   : > { %p3240_p3 = scmp.ne.s32.totalorder %s3967_s29, %s3239_s18  ;;  %p3246_p6 = scmp.lt.u32.totalorder %s3244_s28, %s3239_s18 }
  0xe3   : > { %p3248_p2 = scmp.lt.u32.totalorder %s3239_s18, %s3967_s29 }
  0xe4   : > { %p3242_p0 = pnand %p3240_p3, %p3798_p7  ;;  %p3247_p1 = por %p3246_p6, %p3245_p10 }
  0xe6   : > { %p3243_p4 = pneg %p3242_p0  ;;  %p3249_p5 = por %p3248_p2, %p3247_p1 }
  0xe8   : > { %p3250_p9 = pnand %p3249_p5, %p3243_p4 }
  0xea   : > { %3253 = shalt.err (!%p3250_p9)
}
  0xeb   : > { %s3254_s17 = scalar_lea.vmem %s713_s13, 16  ;;  %s3538_s26 = smov [#allocation7]  }
  0xec   : > { %p3255_p11 = scmp.ne.s32.totalorder %s713_s13, %s3254_s17  ;;  %s3259_s6 = sshll.u32 %s3538_s26, 4  ;;  %s3260_s6 = int_to_ptr.vmem [resolvable:$false] %s3259_s6 }
  0xed   : > { %s3261_s19 = scalar_lea.vmem %s3260_s6, 32  ;;  %p3262_p3 = scmp.lt.s32.totalorder %s713_s13, %s3260_s6 }
  0xee   : > { %p3257_p8 = pnand %p3255_p11, %p3798_p7  ;;  %p3263_p0 = scmp.lt.s32.totalorder %s3261_s19, %s3254_s17 }
  0xf0   : > { %p3258_p12 = pneg %p3257_p8  ;;  %p3264_p13 = por %p3263_p0, %p3262_p3 }
  0xf2   : > { %p3265_p6 = pnand %p3264_p13, %p3258_p12 }
  0xf4   : > { %3268 = shalt.err (!%p3265_p6)
}
  0xf5   : > { %p4605_p10 = scmp.ne.s32.totalorder %s4585_s15, 0  ;;  %s4606_s18 = scalar_lea.sflag [#allocation6], %s3771_s16 }
  0xf6   : > { %s3269_s24 = scalar_lea.hbm %s3957_s5, 256  ;;  %s3274_s11 = scalar_lea.hbm %s4603_s7, 512 }
  0xf7   : > { %2917 = dma.hbm_to_vmem [thread:$0]  (!%p4605_p10), %s3967_s29, 16, %s713_s13, %s4606_s18  }
  0xf8   : > { %p3270_p4 = scmp.ne.s32.totalorder %s3957_s5, %s3269_s24  ;;  %p3275_p13 = scmp.lt.u32.totalorder %s3957_s5, %s4603_s7 }
  0xf9   : > { %p3276_p5 = scmp.lt.u32.totalorder %s3274_s11, %s3269_s24  ;;  %p3278_p11 = scmp.lt.u32.totalorder %s3269_s24, %s3957_s5 }
  0xfa   : > { %p3272_p1 = pnand %p3270_p4, %p3798_p7 }
  0xfb   : > { %p3277_p9 = por %p3276_p5, %p3275_p13 }
  0xfc   : > { %p3273_p2 = pneg %p3272_p1 }
  0xfd   : > { %p3279_p8 = por %p3278_p11, %p3277_p9 }
  0xff   : > { %p3280_p12 = pnand %p3279_p8, %p3273_p2 }
 0x101   : > { %3283 = shalt.err (!%p3280_p12)
}
 0x102   : > { %s3284_s29 = scalar_lea.vmem %s3961_s27, 256  ;;  %s3539_s13 = smov [#allocation10]  }
 0x103   : > { %p3285_p3 = scmp.ne.s32.totalorder %s3961_s27, %s3284_s29  ;;  %s3289_s6 = sshll.u32 %s3539_s13, 4  ;;  %s3290_s6 = int_to_ptr.vmem [resolvable:$false] %s3289_s6 }
 0x104   : > { %s3291_s19 = scalar_lea.vmem %s3290_s6, 512  ;;  %p3292_p4 = scmp.lt.s32.totalorder %s3961_s27, %s3290_s6 }
 0x105   : > { %p3287_p0 = pnand %p3285_p3, %p3798_p7  ;;  %p3293_p1 = scmp.lt.s32.totalorder %s3291_s19, %s3284_s29 }
 0x107   : > { %p3288_p6 = pneg %p3287_p0  ;;  %p3294_p13 = por %p3293_p1, %p3292_p4 }
 0x109   : > { %p3295_p5 = pnand %p3294_p13, %p3288_p6 }
 0x10b   : > { %3298 = shalt.err (!%p3295_p5)
}
 0x10c   : > { %s4607_s18 = scalar_lea.sflag [#allocation9], %s3771_s16  ;;  %s4608_s10 = sld [smem:[#allocation53_spill]] }
 0x10d   : > { %2923 = dma.hbm_to_vmem [thread:$0]  (!%p4605_p10), %s3957_s5, 256, %s3961_s27, %s4607_s18, %s3536_s8, %s3536_s8, %s3537_s9  }
 0x10e   : > { %s785_s11 = scalar_lea.vmem [#allocation13], %s3764_s20 }
 0x10f   : > { %s792_s17 = sshll.u32 %s785_s11, 4  ;;  %s793_s17 = int_to_ptr.vmem [resolvable:$true] %s792_s17 }
 0x112   : > { %s4019_s23 = scalar_lea.hbm %s4608_s10, %s3780_s30  ;;  %s3304_s8 = scalar_lea.hbm %s4608_s10, 32 }
 0x113   : > { %s3299_s26 = scalar_lea.hbm %s4019_s23, 16  ;;  %p3305_p8 = scmp.lt.u32.totalorder %s4019_s23, %s4608_s10 }
 0x114   : > { %p3300_p2 = scmp.ne.s32.totalorder %s4019_s23, %s3299_s26  ;;  %p3306_p12 = scmp.lt.u32.totalorder %s3304_s8, %s3299_s26 }
 0x115   : > { %p3308_p0 = scmp.lt.u32.totalorder %s3299_s26, %s4019_s23 }
 0x116   : > { %p3302_p9 = pnand %p3300_p2, %p3798_p7  ;;  %p3307_p3 = por %p3306_p12, %p3305_p8 }
 0x118   : > { %p3303_p11 = pneg %p3302_p9  ;;  %p3309_p6 = por %p3308_p0, %p3307_p3 }
 0x11a   : > { %p3310_p4 = pnand %p3309_p6, %p3303_p11 }
 0x11c   : > { %3313 = shalt.err (!%p3310_p4)
}
 0x11d   : > { %s3314_s27 = scalar_lea.vmem %s793_s17, 16  ;;  %s3540_s6 = smov [#allocation13]  }
 0x11e   : > { %p3315_p1 = scmp.ne.s32.totalorder %s793_s17, %s3314_s27  ;;  %s3319_s19 = sshll.u32 %s3540_s6, 4  ;;  %s3320_s19 = int_to_ptr.vmem [resolvable:$false] %s3319_s19 }
 0x11f   : > { %s3321_s18 = scalar_lea.vmem %s3320_s19, 32  ;;  %p3322_p2 = scmp.lt.s32.totalorder %s793_s17, %s3320_s19 }
 0x120   : > { %p3317_p13 = pnand %p3315_p1, %p3798_p7  ;;  %p3323_p9 = scmp.lt.s32.totalorder %s3321_s18, %s3314_s27 }
 0x122   : > { %p3318_p5 = pneg %p3317_p13  ;;  %p3324_p10 = por %p3323_p9, %p3322_p2 }
 0x124   : > { %p3325_p8 = pnand %p3324_p10, %p3318_p5 }
 0x126   : > { %3328 = shalt.err (!%p3325_p8)
}
 0x127   : > { %p4609_p12 = scmp.ne.s32.totalorder %s4585_s15, 0  ;;  %s4610_s24 = scalar_lea.sflag [#allocation12], %s3771_s16 }
 0x128   : > { %s4611_s12 = sld [smem:[#allocation55_spill]]  ;;  %s819_s29 = scalar_lea.vmem [#allocation16], %s3764_s20 }
 0x129   : > { %2929 = dma.hbm_to_vmem [thread:$0]  (!%p4609_p12), %s4019_s23, 16, %s793_s17, %s4610_s24  }
 0x12a   : > { %s826_s13 = sshll.u32 %s819_s29, 4  ;;  %s827_s13 = int_to_ptr.vmem [resolvable:$true] %s826_s13 }
 0x12e   : > { %s4045_s26 = scalar_lea.hbm %s4611_s12, %s3780_s30  ;;  %s3334_s23 = scalar_lea.hbm %s4611_s12, 32 }
 0x12f   : > { %s3329_s8 = scalar_lea.hbm %s4045_s26, 16  ;;  %p3335_p0 = scmp.lt.u32.totalorder %s4045_s26, %s4611_s12 }
 0x130   : > { %p3330_p10 = scmp.ne.s32.totalorder %s4045_s26, %s3329_s8  ;;  %p3336_p6 = scmp.lt.u32.totalorder %s3334_s23, %s3329_s8 }
 0x131   : > { %p3338_p1 = scmp.lt.u32.totalorder %s3329_s8, %s4045_s26 }
 0x132   : > { %p3332_p11 = pnand %p3330_p10, %p3798_p7  ;;  %p3337_p4 = por %p3336_p6, %p3335_p0 }
 0x134   : > { %p3333_p3 = pneg %p3332_p11  ;;  %p3339_p13 = por %p3338_p1, %p3337_p4 }
 0x136   : > { %p3340_p5 = pnand %p3339_p13, %p3333_p3 }
 0x138   : > { %3343 = shalt.err (!%p3340_p5)
}
 0x139   : > { %s3344_s30 = scalar_lea.vmem %s827_s13, 16  ;;  %s3541_s20 = smov [#allocation16]  }
 0x13a   : > { %p3345_p2 = scmp.ne.s32.totalorder %s827_s13, %s3344_s30  ;;  %s3349_s6 = sshll.u32 %s3541_s20, 4  ;;  %s3350_s6 = int_to_ptr.vmem [resolvable:$false] %s3349_s6 }
 0x13b   : > { %s3351_s19 = scalar_lea.vmem %s3350_s6, 32  ;;  %p3352_p10 = scmp.lt.s32.totalorder %s827_s13, %s3350_s6 }
 0x13c   : > { %p3347_p9 = pnand %p3345_p2, %p3798_p7  ;;  %p3353_p11 = scmp.lt.s32.totalorder %s3351_s19, %s3344_s30 }
 0x13e   : > { %p3348_p8 = pneg %p3347_p9  ;;  %p3354_p12 = por %p3353_p11, %p3352_p10 }
 0x140   : > { %p3355_p0 = pnand %p3354_p12, %p3348_p8 }
 0x142   : > { %3358 = shalt.err (!%p3355_p0)
}
 0x143   : > { %p4612_p6 = scmp.ne.s32.totalorder %s4585_s15, 0  ;;  %s4613_s18 = scalar_lea.sflag [#allocation15], %s3771_s16 }
 0x144   : > { %p4614_p3 = scmp.ne.s32.totalorder %s4592_s2, 0 }
 0x145   : > { %2935 = dma.hbm_to_vmem [thread:$0]  (!%p4612_p6), %s4045_s26, 16, %s827_s13, %s4613_s18  }
 0x146   : > { %835 = sbr.rel (%p4614_p3) target bundleno = 3566 (0xdee), region = 96 }
 0x14d   : > { %s4070_s14 = sand.u32 1, %s3505_s3   ;;  %p4615_p7 = scmp.ne.s32.totalorder %s4579_s1, 0 }
 0x14e   : > { %s2675_s24 = sshll.u32 %s4070_s14, 4  ;;  %s838_s28 = scalar_lea.sflag [#allocation3], %s4070_s14 }
 0x14f   : > { %s4074_s11 = scalar_lea.vmem [#allocation2], %s2675_s24 }
 0x150   : > { %3460 = dma.done.wait (%p4615_p7), %s838_s28, 256  }
 0x151   : > { %3462 = vsyncadd (%p4615_p7), %s838_s28, 4294967040  ;;  %s846_s16 = sand.u32 1, %s3718_s22  }
 0x152   : > { %s847_s15 = scalar_lea.sflag [#allocation6], %s846_s16 }
 0x153   : > { %3464 = dma.done.wait (%p4615_p7), %s847_s15, 32  }
 0x154   : > { %3466 = vsyncadd (%p4615_p7), %s847_s15, 4294967264  ;;  %s863_s29 = scalar_lea.sflag [#allocation9], %s846_s16 }
 0x155   : > { %3468 = dma.done.wait (%p4615_p7), %s863_s29, 272  }
 0x156   : > { %3470 = vsyncadd (%p4615_p7), %s863_s29, 4294967024  ;;  %s4092_s22 = scalar_lea.vmem [#allocation10], %s2675_s24  ;;  %s880_s8 = scalar_lea.sflag [#allocation12], %s846_s16 }
 0x157   : > { %3472 = dma.done.wait (%p4615_p7), %s880_s8, 32  }
 0x158   : > { %3474 = vsyncadd (%p4615_p7), %s880_s8, 4294967264  ;;  %s896_s23 = scalar_lea.sflag [#allocation15], %s846_s16 }
 0x159   : > { %3476 = dma.done.wait (%p4615_p7), %s896_s23, 32  }
 0x15a   : > { %3478 = vsyncadd (%p4615_p7), %s896_s23, 4294967264  ;;  %s4616_s27 = sld [smem:[#allocation32_spill]]  ;;  %s4106_s30 = sand.u32 1, %s3493_s25  }
 0x15b   : > { %4617 = sst [smem:[#allocation42_spill]] %s4106_s30  ;;  %s2677_s20 = sshll.u32 %s4106_s30, 3 }
 0x15c   : > { %s2678_s6 = sshll.u32 %s4106_s30, 5  ;;  %p1024_p12 = scmp.lt.s32.totalorder %s3517_s0, 1 }
 0x15d   : > { %s4618_s15 = sld [smem:[#allocation43_spill]]  ;;  %s4619_s5 = sld [smem:[#allocation44_spill]] }
 0x15e   : > { %s1025_s19 = scalar_select %p1024_p12, %s3517_s0, 1 }
 0x15f   : > { %s4620_s2 = sld [smem:[#allocation45_spill]]  ;;  %s4621_s4 = sld [smem:[#allocation64_spill]] }
 0x160   : > { %p1028_p4 = scmp.lt.s32.totalorder %s4616_s27, 1  ;;  %s2679_s1 = sshll.u32 %s1025_s19, 3 }
 0x161   : > { %s2684_s24 = sshll.u32 %s1025_s19, 2  ;;  %s4622_s30 = sld [smem:[#allocation52_spill]] }
 0x162   : > { %s4114_s18 = scalar_select %p1028_p4, %s4616_s27, 1 }
 0x163   : > { %s1027_s29 = scalar_lea.vmem %s4618_s15, %s2679_s1  ;;  %s906_s1 = scalar_lea.vmem [#allocation16], %s4070_s14 }
 0x164   : > { %s2736_s8 = sshll.u32 %s4114_s18, 4  ;;  %s2737_s10 = sshll.u32 %s4114_s18, 5 }
 0x165   : > { %s1032_s9 = scalar_lea.vmem %s4619_s5, %s2736_s8  ;;  %s1035_s7 = scalar_lea.vmem %s4620_s2, %s4114_s18 }
 0x166   : > { %s4131_s3 = scalar_lea.vmem %s4621_s4, %s2684_s24  ;;  %s4139_s16 = scalar_lea.vmem [#allocation17], %s2677_s20 }
 0x167   : > { %s4136_s28 = scalar_lea.vmem %s4622_s30, %s2737_s10  ;;  %s4141_s17 = scalar_lea.vmem [#allocation18], %s2678_s6 }
 0x168   : > { %p2685_p1 = scmp.ne.s32.totalorder %s4616_s27, 0 }
 0x169   : > { %v1050_v0 = vld [vmem:[%s1027_s29] sm:$0xff] (!%p2685_p1)  ;;  %vm1051_vm0 = vcmask (!%p2685_p1), 261120  }
 0x16a   : > { %1049 = sbr.rel (%p2685_p1) target bundleno = 369 (0x171), region = 136  ;;  %1052 = vst.msk [vmem:[%s4139_s16] sm:$0xff] (!%p2685_p1), %vm1051_vm0, %v1050_v0 }
 0x171 PF: > { %v3045_v1 = vld [vmem:[%s1032_s9] sm:$0xff]   ;;  %v1122_v2 = vlaneseq  ;;  %v3542_v3 = vmov 0.0   ;;  %v3046_v4 = vld [vmem:[%s1032_s9 + $0x8] sm:$0xff]   ;;  %vm3543_vm1 = vmmov 0   ;;  %v3544_v8 = vmov 1966171168  }
 0x172   : > { %2778 = vmatprep.subr.bf16.mxu0 %v3542_v3  ;;  %2786 = vmatprep.subr.bf16.mxu1 %v3542_v3  ;;  %v4150_v5 = vld [vmem:[%s4139_s16] sm:$0xff]  ;;  %v1136_v9 = vunpack.c.l.s4 %v3544_v8  ;;  %vm1078_vm2 = vcmask 261120   ;;  %s3545_s10 = smov 32   ;;  %v2686_v30 = vld [vmem:[%s1035_s7] ss:$0 sm:$0xff]  ;;  %s3546_s4 = smov 96  }
 0x173   : > { %2779 = vmatpush3.bf16.msra.mxu0 %v3045_v1  ;;  %2782 = vmatprep.mubr.msk.bf16.mxu0 %vm3543_vm1, %v3542_v3  ;;  %v1123_v6 = vand.u32 127, %v1122_v2  ;;  %v4152_v7 = vshrl.u32 %v1122_v2, 7  ;;  %v1054_v12 = vpack.c.bf16 %v4150_v5, %v4150_v5  ;;  %vm1423_vm6 = vcmask 64512   ;;  %s3547_s7 = smov 64   ;;  %s4625_s2 = scalar_lea.vmem [#allocation7], %s4070_s14 }
 0x174   : > { %2780 = vmatprep.subr.bf16.mxu0 %v3542_v3  ;;  %2788 = vmatprep.mubr.msk.bf16.mxu1 %vm3543_vm1, %v3542_v3  ;;  %v1137_v13 = vunpack.c.0.s8 %v1136_v9  ;;  %vm1482_vm7 = vcmask 1043456   ;;  %s4626_s26 = scalar_lea.vmem [#allocation8], %s4070_s14  ;;  %s4627_s13 = scalar_lea.vmem [#allocation11], %s4070_s14  ;;  %vm1887_vm8 = vcmask 523264  }
 0x175   : > { %v1126_v10 = vmul.u32 8, %v4152_v7  ;;  %v1128_v11 = vadd.s32 1, %v4152_v7  ;;  %v1161_v18 = vsub.s32 0, %v4152_v7  ;;  %s4629_s9 = scalar_lea.vmem [#allocation14], %s4070_s14  ;;  %s4630_s5 = sld [smem:[#allocation32_spill]] }
 0x176   : > { %v1140_v15 = vsub.s32 %v1137_v13, %v4152_v7 }
 0x177   : > { %2781 = vmatpush3.bf16.msra.mxu0 %v3046_v4  ;;  %vm1127_vm3 = vcmp.ge.s32.totalorder %v1123_v6, %v1126_v10  ;;  %v1129_v14 = vmul.u32 8, %v1128_v11 }
 0x178   : > { %2792 = vmatprep.subr.bf16.mxu0 %v3542_v3 }
 0x179   : > { %vm1130_vm4 = vcmp.lt.s32.totalorder %v1123_v6, %v1129_v14 }
 0x17a   : > { %2783 = vmatmul.mubr.msk.bf16.vlgmr.msra.gmra.mrb[0].mxu0 %vm1078_vm2, %v1054_v12  ;;  %vm1131_vm5 = vmand %vm1127_vm3, %vm1130_vm4 }
 0x17b   : > { %v2690_v16 = vsel %vm1131_vm5, 1.0, %v3542_v3  ;;  %2794 = vmatprep.mubr.msk.bf16.mxu0 %vm3543_vm1, %v3542_v3  ;;  %p2717_p13 = scmp.ne.s32.totalorder %s4630_s5, 1 }
 0x17c   : > { %v1141_v17 = vrot.slane %v2690_v16, %v1140_v15  ;;  %s4631_s30 = sld [smem:[#allocation56_spill]] (!%p2717_p13)  ;;  %vm3549_vm9 = vmmov (!%p2717_p13), 0   ;;  %s4633_s21 = sld [smem:[#allocation57_spill]] (!%p2717_p13)  ;;  %vm2165_vm10 = vcmask (!%p2717_p13), 1041409   ;;  %vm2168_vm11 = vcmask (!%p2717_p13), 1042434  }
 0x17d   : > { %vm2171_vm12 = vcmask (!%p2717_p13), 256000   ;;  %vm2236_vm13 = vcmp.eq.s32.totalorder (!%p2717_p13), %v4152_v7, 1  ;;  %vm2229_vm14 = vcmp.eq.s32.totalorder (!%p2717_p13), %v4152_v7, 0  ;;  %s4637_s27 = sld [smem:[#allocation61_spill]] (!%p2717_p13)  ;;  %vm2280_vm15 = vcmask (!%p2717_p13), 2048  }
 0x17e   : > { %v1149_v19 = vrot.slane %v1141_v17, %v1140_v15  ;;  %v1142_v20 = vcombine.high %v1141_v17, %v1141_v17 }
 0x180   : > { %v4168_v21 = vrot.slane %v1149_v19, %v1161_v18  ;;  %v1157_v22 = vcombine.high %v1149_v19, %v1149_v19  ;;  %v1156_v23 = vrot.slane %v1142_v20, %v1140_v15 }
 0x182   : > { %1183 = vrot.lane.b32.xlu0 %v4168_v21, %s3545_s10  ;;  %v4171_v24 = vrot.slane %v1157_v22, %v1161_v18  ;;  %v4173_v25 = vrot.slane %v1156_v23, %v1161_v18  ;;  %v1158_v26 = vcombine.high %v1156_v23, %v1156_v23  ;;  %s4632_s20 = smov (!%p2717_p13), %s4631_s30 }
 0x184   : > { %1187 = vrot.lane.b32.xlu1 %v4171_v24, %s3545_s10  ;;  %v4176_v27 = vrot.slane %v1158_v26, %v1161_v18 }
 0x186   : > { %1185 = vrot.lane.b32.xlu0 %v4173_v25, %s3545_s10 }
 0x188   : > { %1189 = vrot.lane.b32.xlu1 %v4176_v27, %s3545_s10 }
 0x1f4   : > { %v1184_v28 = vpop.permute.xlu0 %1183 }
 0x1f6   : > { %v1188_v29 = vpop.permute.xlu1 %1187 }
 0x1f8   : > { %v1186_v32 = vpop.permute.xlu0 %1185 }
 0x1fa   : > { %v1190_v35 = vpop.permute.xlu1 %1189 }
 0x24d   : > { %v1116_v31 = vpop.f32.mrb[0].mxu0 }
 0x24e   : > { %v4185_v33 = vadd.f32 %v2686_v30, %v1116_v31  ;;  %v2784_v34 = vpop.f32.mrb[1].mxu0 }
 0x24f   : > { %v1119_v36 = vpop.f32.mrb[2].mxu0 }
 0x250   : > { %v1196_v37 = vmul.f32 %v1186_v32, %v4185_v33  ;;  %v2785_v38 = vpop.f32.mrb[3].mxu0  ;;  %v1195_v39 = vmul.f32 %v1184_v28, %v4185_v33  ;;  %v1198_v41 = vmul.f32 %v1190_v35, %v4185_v33  ;;  %v1197_v43 = vmul.f32 %v1188_v29, %v4185_v33 }
 0x251   : > { %v1179_v50 = vmul.f32 %v4168_v21, %v4185_v33  ;;  %v1180_v51 = vmul.f32 %v4173_v25, %v4185_v33  ;;  %v1181_v58 = vmul.f32 %v4171_v24, %v4185_v33  ;;  %v1182_v59 = vmul.f32 %v4176_v27, %v4185_v33 }
 0x252   : > { %v1220_v40 = vpack.c.bf16 %v1196_v37, %v1196_v37  ;;  %v1219_v42 = vpack.c.bf16 %v1195_v39, %v1195_v39  ;;  %v1222_v44 = vpack.c.bf16 %v1198_v41, %v1198_v41  ;;  %v1221_v45 = vpack.c.bf16 %v1197_v43, %v1197_v43 }
 0x253   : > { %v1215_v54 = vpack.c.bf16 %v1179_v50, %v1179_v50  ;;  %v1216_v55 = vpack.c.bf16 %v1180_v51, %v1180_v51  ;;  %v1217_v60 = vpack.c.bf16 %v1181_v58, %v1181_v58  ;;  %v1218_v61 = vpack.c.bf16 %v1182_v59, %v1182_v59 }
 0x254   : > { %1273 = vrot.lane.b32.xlu1 %v1220_v40, %s3546_s4  ;;  %1224 = vrot.lane.b32.xlu0 %v1219_v42, %s3546_s4 }
 0x258   : > { %1371 = vrot.lane.b32.xlu1 %v1222_v44, %s3546_s4  ;;  %1322 = vrot.lane.b32.xlu0 %v1221_v45, %s3546_s4 }
 0x2c6   : > { %v1274_v46 = vpop.permute.xlu1 %1273  ;;  %v1225_v47 = vpop.permute.xlu0 %1224 }
 0x2c7   : > { %v1279_v48 = vsel %vm1078_vm2, %v1274_v46, 0  ;;  %v1230_v49 = vsel %vm1078_vm2, %v1225_v47, 0 }
 0x2c8   : > { %2787 = vmatpush3.bf16.xpose.msra.mxu1 %v1230_v49  ;;  %2793 = vmatpush3.bf16.xpose.msra.mxu0 %v1279_v48 }
 0x2c9   : > { %2798 = vmatprep.subr.bf16.mxu1 %v3542_v3  ;;  %2804 = vmatprep.subr.bf16.mxu0 %v3542_v3 }
 0x2ca   : > { %v1372_v52 = vpop.permute.xlu1 %1371  ;;  %v1323_v53 = vpop.permute.xlu0 %1322 }
 0x2cb   : > { %v1377_v56 = vsel %vm1078_vm2, %v1372_v52, 0  ;;  %v1328_v57 = vsel %vm1078_vm2, %v1323_v53, 0 }
 0x2cf   : > { %2789 = vmatmul.mubr.msk.bf16.vlgmr.msra.gmra.mrb[0].mxu1 %vm1078_vm2, %v1215_v54  ;;  %2795 = vmatmul.mubr.msk.bf16.vlgmr.msra.gmra.mrb[4].mxu0 %vm1078_vm2, %v1216_v55 }
 0x2d0   : > { %2799 = vmatpush3.bf16.xpose.msra.mxu1 %v1328_v57  ;;  %2805 = vmatpush3.bf16.xpose.msra.mxu0 %v1377_v56 }
 0x2d1   : > { %2800 = vmatprep.mubr.msk.bf16.mxu1 %vm3543_vm1, %v3542_v3  ;;  %2806 = vmatprep.mubr.msk.bf16.mxu0 %vm3543_vm1, %v3542_v3 }
 0x2d2   : > { %2810 = vmatprep.subr.bf16.mxu1 %v3542_v3  ;;  %2816 = vmatprep.subr.bf16.mxu0 %v3542_v3 }
 0x2d7   : > { %2801 = vmatmul.mubr.msk.bf16.vlgmr.msra.gmra.mrb[4].mxu1 %vm1078_vm2, %v1217_v60  ;;  %2807 = vmatmul.mubr.msk.bf16.vlgmr.msra.gmra.mrb[8].mxu0 %vm1078_vm2, %v1218_v61 }
 0x2d8   : > { %2812 = vmatprep.mubr.msk.bf16.mxu1 %vm3543_vm1, %v3542_v3  ;;  %2818 = vmatprep.mubr.msk.bf16.mxu0 %vm3543_vm1, %v3542_v3 }
 0x3a2   : > { %v1266_v62 = vpop.f32.mrb[0].mxu1  ;;  %v1315_v63 = vpop.f32.mrb[4].mxu0 }
 0x3a3   : > { %v1419_v0 = vmul.f32 0.35355338, %v1266_v62  ;;  %v1420_v1 = vmul.f32 0.35355338, %v1315_v63  ;;  %v2790_v2 = vpop.f32.mrb[1].mxu1  ;;  %v2796_v4 = vpop.f32.mrb[5].mxu0 }
 0x3a4   : > { %v1269_v6 = vpop.f32.mrb[2].mxu1  ;;  %v1318_v8 = vpop.f32.mrb[6].mxu0 }
 0x3a5   : > { %v2791_v9 = vpop.f32.mrb[3].mxu1  ;;  %v2797_v10 = vpop.f32.mrb[7].mxu0  ;;  %v1424_v11 = vsel %vm1423_vm6, %v1419_v0, -inf  ;;  %v1427_v12 = vsel %vm1423_vm6, %v1420_v1, -inf }
 0x3a6   : > { %1425 = vmax.xlane.f32.xlu0 %v1424_v11  ;;  %1428 = vmax.xlane.f32.xlu1 %v1427_v12 }
 0x3aa   : > { %v1364_v13 = vpop.f32.mrb[4].mxu1  ;;  %v1413_v14 = vpop.f32.mrb[8].mxu0 }
 0x3ab   : > { %v1421_v15 = vmul.f32 0.35355338, %v1364_v13  ;;  %v2802_v16 = vpop.f32.mrb[5].mxu1  ;;  %v2808_v17 = vpop.f32.mrb[9].mxu0  ;;  %v1422_v20 = vmul.f32 0.35355338, %v1413_v14 }
 0x3ac   : > { %v1367_v18 = vpop.f32.mrb[6].mxu1  ;;  %v1416_v19 = vpop.f32.mrb[10].mxu0 }
 0x3ad   : > { %v2803_v22 = vpop.f32.mrb[7].mxu1  ;;  %v2809_v23 = vpop.f32.mrb[11].mxu0  ;;  %v1430_v26 = vsel %vm1423_vm6, %v1421_v15, -inf  ;;  %v1433_v28 = vsel %vm1423_vm6, %v1422_v20, -inf }
 0x3ae   : > { %1431 = vmax.xlane.f32.xlu0 %v1430_v26  ;;  %v3048_v22 = vld [vmem:[%s4074_s11 + $0x8] sm:$0xff]  }
 0x3b2   : > { %1434 = vmax.xlane.f32.xlu0 %v1433_v28 }
 0x3b7   : > { %1199 = vrot.lane.b32.xlu1 %v4168_v21, %s3547_s7 }
 0x3bb   : > { %1203 = vrot.lane.b32.xlu1 %v4171_v24, %s3547_s7 }
 0x3bf   : > { %1205 = vrot.lane.b32.xlu1 %v4176_v27, %s3547_s7 }
 0x3c8   : > { %1201 = vrot.lane.b32.xlu0 %v4173_v25, %s3547_s7 }
 0x433   : > { %v1426_v29 = vpop.xlane.xlu0 %1425  ;;  %v1429_v30 = vpop.xlane.xlu1 %1428 }
 0x434   : > { %v1436_v31 = vsub.f32 %v1419_v0, %v1426_v29  ;;  %v1437_v42 = vsub.f32 %v1420_v1, %v1429_v30 }
 0x436   : > { %v1440_v32 = vmul.f32 1.442695, %v1436_v31  ;;  %v1442_v45 = vmul.f32 1.442695, %v1437_v42 }
 0x437   : > { %v1200_v34 = vpop.permute.xlu1 %1199 }
 0x438   : > { %3055 = vpow2.f32 %v1440_v32  ;;  %v1211_v35 = vmul.f32 %v1200_v34, %v4185_v33 }
 0x43a   : > { %v1472_v36 = vpack.c.bf16 %v1211_v35, %v1211_v35 }
 0x43b   : > { %v1432_v37 = vpop.xlane.xlu0 %1431  ;;  %v1204_v52 = vpop.permute.xlu1 %1203 }
 0x43c   : > { %v1438_v21 = vsub.f32 %v1421_v15, %v1432_v37  ;;  %1477 = vrot.lane.b32.xlu1 %v1472_v36, %s3547_s7  ;;  %v1213_v53 = vmul.f32 %v1204_v52, %v4185_v33 }
 0x43e   : > { %v1444_v24 = vmul.f32 1.442695, %v1438_v21  ;;  %v1474_v55 = vpack.c.bf16 %v1213_v53, %v1213_v53 }
 0x43f   : > { %v1435_v38 = vpop.xlane.xlu0 %1434  ;;  %v1206_v54 = vpop.permute.xlu1 %1205 }
 0x440   : > { %3057 = vpow2.f32 %v1444_v24  ;;  %v1439_v27 = vsub.f32 %v1422_v20, %v1435_v38  ;;  %v1214_v56 = vmul.f32 %v1206_v54, %v4185_v33  ;;  %v3047_v20 = vld [vmem:[%s4074_s11] sm:$0xff]   ;;  %s4624_s11 = scalar_lea.vmem [#allocation5], %s4070_s14 }
 0x442   : > { %v3056_v39 = vpop.eup %3055  ;;  %v1446_v40 = vmul.f32 1.442695, %v1439_v27  ;;  %v1475_v57 = vpack.c.bf16 %v1214_v56, %v1214_v56 }
 0x443   : > { %v1448_v25 = vsel %vm1423_vm6, %v3056_v39, 0.0  ;;  %v1202_v48 = vpop.permute.xlu0 %1201 }
 0x444   : > { %3059 = vpow2.f32 %v1446_v40  ;;  %1449 = vadd.xlane.f32.xlu0 %v1448_v25  ;;  %v1212_v50 = vmul.f32 %v1202_v48, %v4185_v33 }
 0x445   : > { %3061 = vpow2.f32 %v1442_v45 }
 0x446   : > { %v1473_v51 = vpack.c.bf16 %v1212_v50, %v1212_v50 }
 0x44a   : > { %v3058_v41 = vpop.eup %3057 }
 0x44b   : > { %v1454_v43 = vsel %vm1423_vm6, %v3058_v41, 0.0 }
 0x44c   : > { %1455 = vadd.xlane.f32.xlu0 %v1454_v43 }
 0x44e   : > { %v3060_v44 = vpop.eup %3059 }
 0x44f   : > { %v1457_v46 = vsel %vm1423_vm6, %v3060_v44, 0.0  ;;  %v3062_v47 = vpop.eup %3061 }
 0x450   : > { %1458 = vadd.xlane.f32.xlu0 %v1457_v46  ;;  %v1451_v49 = vsel %vm1423_vm6, %v3062_v47, 0.0 }
 0x460   : > { %1452 = vadd.xlane.f32.xlu1 %v1451_v49 }
 0x466   : > { %1527 = vrot.lane.b32.xlu0 %v1473_v51, %s3547_s7 }
 0x471   : > { %1576 = vrot.lane.b32.xlu1 %v1474_v55, %s3547_s7 }
 0x475   : > { %1625 = vrot.lane.b32.xlu1 %v1475_v57, %s3547_s7  ;;  %s4634_s7 = sld [smem:[#allocation58_spill]] (!%p2717_p13) }
 0x4ae   : > { %v1478_v58 = vpop.permute.xlu1 %1477 }
 0x4af   : > { %v1484_v59 = vsel %vm1482_vm7, %v1478_v58, 0 }
 0x4b0   : > { %2811 = vmatpush3.bf16.msra.mxu1 %v1484_v59 }
 0x4b1   : > { %2822 = vmatprep.subr.bf16.mxu1 %v3542_v3 }
 0x4d1   : > { %v1450_v60 = vpop.xlane.xlu0 %1449 }
 0x4d2   : > { %3063 = vrcp.f32 %v1450_v60  ;;  %v3049_v60 = vld [vmem:[%s4092_s22] sm:$0xff]  }
 0x4d9   : > { %v1456_v61 = vpop.xlane.xlu0 %1455 }
 0x4da   : > { %3065 = vrcp.f32 %v1456_v61  ;;  %v3050_v61 = vld [vmem:[%s4092_s22 + $0x8] sm:$0xff]   ;;  %s4628_s22 = scalar_lea.vmem [#allocation13], %s4070_s14 }
 0x4dc   : > { %v3064_v62 = vpop.eup %3063 }
 0x4dd   : > { %v4245_v63 = vmul.f32 %v3064_v62, %v3056_v39  ;;  %v1459_v0 = vpop.xlane.xlu0 %1458  ;;  %v3052_v62 = vld [vmem:[%s4136_s28 + $0x8] sm:$0xff]  }
 0x4df   : > { %v1468_v33 = vpack.c.bf16 %v4245_v63, %v4245_v63  ;;  %1966 = vst.msk [vmem:[%s4141_s17] sm:$0xff] (!%p2717_p13), %vm1423_vm6, %v4245_v63  ;;  %v3076_v63 = vld [vmem:[%s4632_s20 + $0x10] sm:$0xff] (!%p2717_p13)  }
 0x4e1   : > { %2813 = vmatmul.mubr.msk.bf16.vlgmr.msra.gmra.mrb[8].mxu1 %vm1423_vm6, %v1468_v33  ;;  %v1528_v1 = vpop.permute.xlu0 %1527 }
 0x4e2   : > { %v1533_v2 = vsel %vm1482_vm7, %v1528_v1, 0  ;;  %2824 = vmatprep.mubr.msk.bf16.mxu1 %vm3543_vm1, %v3542_v3 }
 0x4e3   : > { %2817 = vmatpush3.bf16.msra.mxu0 %v1533_v2 }
 0x4e4   : > { %2828 = vmatprep.subr.bf16.mxu0 %v3542_v3  ;;  %v3066_v4 = vpop.eup %3065 }
 0x4e5   : > { %v4254_v8 = vmul.f32 %v3066_v4, %v3058_v41  ;;  %v2703_v4 = vld [vmem:[%s4625_s2] ss:$0 sm:$0xff] }
 0x4e7   : > { %v1470_v11 = vpack.c.bf16 %v4254_v8, %v4254_v8  ;;  %1968 = vst.msk [vmem:[%s4141_s17 + $0x10] sm:$0xff] (!%p2717_p13), %vm1423_vm6, %v4254_v8 }
 0x4ed   : > { %v1453_v6 = vpop.xlane.xlu1 %1452 }
 0x4ee   : > { %3067 = vrcp.f32 %v1453_v6 }
 0x4ef   : > { %3069 = vrcp.f32 %v1459_v0 }
 0x4f1   : > { %v1577_v9 = vpop.permute.xlu1 %1576 }
 0x4f2   : > { %v1582_v10 = vsel %vm1482_vm7, %v1577_v9, 0  ;;  %v2704_v9 = vld [vmem:[%s4626_s26] ss:$0 sm:$0xff]  ;;  %s4635_s26 = sld [smem:[#allocation59_spill]] (!%p2717_p13) }
 0x4f3   : > { %2823 = vmatpush3.bf16.msra.mxu1 %v1582_v10 }
 0x4f4   : > { %2834 = vmatprep.subr.bf16.mxu1 %v3542_v3 }
 0x4f5   : > { %v1626_v14 = vpop.permute.xlu1 %1625 }
 0x4f6   : > { %2825 = vmatmul.mubr.msk.bf16.vlgmr.msra.gmra.mrb[12].mxu1 %vm1423_vm6, %v1470_v11  ;;  %v1631_v17 = vsel %vm1482_vm7, %v1626_v14, 0  ;;  %v3053_v14 = vld [vmem:[%s4136_s28 + $0x10] sm:$0xff]  }
 0x4f7   : > { %2838 = vmatprep.mubr.msk.bf16.mxu1 %vm3543_vm1, %v3542_v3  ;;  %2835 = vmatpush3.bf16.msra.mxu1 %v3047_v20 }
 0x4f8   : > { %v3068_v12 = vpop.eup %3067  ;;  %2836 = vmatprep.subr.bf16.mxu1 %v3542_v3 }
 0x4f9   : > { %v4263_v13 = vmul.f32 %v3068_v12, %v3062_v47  ;;  %v3070_v16 = vpop.eup %3069  ;;  %v2699_v47 = vld [vmem:[%s4624_s11] ss:$0 sm:$0xff] }
 0x4fa   : > { %v4271_v18 = vmul.f32 %v3070_v16, %v3060_v44  ;;  %v2705_v16 = vld [vmem:[%s4627_s13] ss:$0 sm:$0xff] }
 0x4fb   : > { %v1469_v15 = vpack.c.bf16 %v4263_v13, %v4263_v13  ;;  %2837 = vmatpush3.bf16.msra.mxu1 %v3048_v22  ;;  %1967 = vst.msk [vmem:[%s4141_s17 + $0x8] sm:$0xff] (!%p2717_p13), %vm1423_vm6, %v4263_v13  ;;  %v3077_v13 = vld [vmem:[%s4632_s20 + $0x8] sm:$0xff] (!%p2717_p13)  }
 0x4fc   : > { %v1471_v19 = vpack.c.bf16 %v4271_v18, %v4271_v18  ;;  %2850 = vmatprep.subr.bf16.mxu1 %v3542_v3  ;;  %1969 = vst.msk [vmem:[%s4141_s17 + $0x18] sm:$0xff] (!%p2717_p13), %vm1423_vm6, %v4271_v18  ;;  %v3078_v18 = vld [vmem:[%s4632_s20 + $0x18] sm:$0xff] (!%p2717_p13)  }
 0x4fd   : > { %2819 = vmatmul.mubr.msk.bf16.vlgmr.msra.gmra.mrb[12].mxu0 %vm1423_vm6, %v1469_v15  ;;  %v3054_v15 = vld [vmem:[%s4136_s28 + $0x18] sm:$0xff]  }
 0x4fe   : > { %2829 = vmatpush3.bf16.msra.mxu0 %v1631_v17  ;;  %2830 = vmatprep.mubr.msk.bf16.mxu0 %vm3543_vm1, %v3542_v3 }
 0x4ff   : > { %2842 = vmatprep.subr.bf16.mxu0 %v3542_v3 }
 0x505   : > { %2831 = vmatmul.mubr.msk.bf16.vlgmr.msra.gmra.mrb[16].mxu0 %vm1423_vm6, %v1471_v19 }
 0x506   : > { %2846 = vmatprep.mubr.msk.bf16.mxu0 %vm3543_vm1, %v3542_v3  ;;  %2843 = vmatpush3.bf16.msra.mxu0 %v3049_v60 }
 0x507   : > { %2844 = vmatprep.subr.bf16.mxu0 %v3542_v3 }
 0x50a   : > { %2845 = vmatpush3.bf16.msra.mxu0 %v3050_v61 }
 0x5b4   : > { %v1520_v23 = vpop.f32.mrb[8].mxu1 }
 0x5b5   : > { %v2814_v26 = vpop.f32.mrb[9].mxu1  ;;  %v1673_v36 = vsel %vm1078_vm2, %v1520_v23, 0.0 }
 0x5b6   : > { %v1523_v28 = vpop.f32.mrb[10].mxu1 }
 0x5b7   : > { %v2815_v29 = vpop.f32.mrb[11].mxu1 }
 0x5c9   : > { %v1618_v30 = vpop.f32.mrb[12].mxu1 }
 0x5ca   : > { %v2826_v31 = vpop.f32.mrb[13].mxu1  ;;  %v1676_v27 = vsel %vm1078_vm2, %v1618_v30, 0.0  ;;  %v2709_v30 = vld [vmem:[%s4628_s22] ss:$0 sm:$0xff] }
 0x5cb   : > { %v1621_v32 = vpop.f32.mrb[14].mxu1 }
 0x5cc   : > { %v2827_v34 = vpop.f32.mrb[15].mxu1 }
 0x5d0   : > { %v1569_v35 = vpop.f32.mrb[12].mxu0 }
 0x5d1   : > { %v1674_v37 = vsel %vm1078_vm2, %v1569_v35, 0.0  ;;  %v2820_v21 = vpop.f32.mrb[13].mxu0 }
 0x5d2   : > { %v1675_v24 = vadd.f32 %v1674_v37, %v1673_v36  ;;  %v1572_v38 = vpop.f32.mrb[14].mxu0 }
 0x5d3   : > { %v2821_v39 = vpop.f32.mrb[15].mxu0 }
 0x5d4   : > { %v1677_v40 = vadd.f32 %v1676_v27, %v1675_v24 }
 0x5d8   : > { %v1667_v25 = vpop.f32.mrb[16].mxu0 }
 0x5d9   : > { %v1678_v41 = vsel %vm1078_vm2, %v1667_v25, 0.0  ;;  %v2832_v42 = vpop.f32.mrb[17].mxu0 }
 0x5da   : > { %v1679_v43 = vadd.f32 %v1678_v41, %v1677_v40  ;;  %v1670_v44 = vpop.f32.mrb[18].mxu0 }
 0x5db   : > { %v2833_v45 = vpop.f32.mrb[19].mxu0 }
 0x5dc   : > { %v1680_v46 = vpack.c.bf16 %v1679_v43, %v1679_v43  ;;  %v2715_v43 = vld [vmem:[%s4629_s9] ss:$0 sm:$0xff]  ;;  %s4636_s9 = sld [smem:[#allocation60_spill]] (!%p2717_p13) }
 0x5dd   : > { %v2716_v45 = vld [vmem:[%s906_s1] ss:$0 sm:$0xff] }
 0x5de   : > { %2839 = vmatmul.mubr.msk.bf16.vlgmr.msra.gmra.mrb[16].mxu1 %vm1078_vm2, %v1680_v46 }
 0x5df   : > { %2858 = vmatprep.mubr.msk.bf16.mxu1 %vm3543_vm1, %v3542_v3 }
 0x6b1   : > { %v1741_v48 = vpop.f32.mrb[16].mxu1 }
 0x6b2   : > { %v1742_v49 = vadd.f32 %v2699_v47, %v1741_v48  ;;  %v2840_v50 = vpop.f32.mrb[17].mxu1  ;;  %v3075_v48 = vld [vmem:[%s4631_s30] sm:$0xff] (!%p2717_p13)  }
 0x6b3   : > { %v1744_v51 = vpop.f32.mrb[18].mxu1 }
 0x6b4   : > { %v2841_v52 = vpop.f32.mrb[19].mxu1  ;;  %v1747_v53 = vadd.f32 %v1742_v49, %v4150_v5  ;;  %v3051_v5 = vld [vmem:[%s4136_s28] sm:$0xff]   ;;  %v3548_v49 = vmov (!%p2717_p13), 0.0  }
 0x6b5   : > { %2851 = vmatpush3.bf16.msra.mxu1 %v3051_v5  ;;  %2862 = vmatprep.subr.bf16.mxu0 (!%p2717_p13), %v3548_v49 }
 0x6b6   : > { %v1750_v54 = vsel %vm1078_vm2, %v1747_v53, 0.0  ;;  %2852 = vmatprep.subr.bf16.mxu1 %v3542_v3 }
 0x6b7   : > { %1751 = vadd.xlane.f32.xlu0 %v1750_v54 }
 0x6b9   : > { %2853 = vmatpush3.bf16.msra.mxu1 %v3052_v62 }
 0x6ba   : > { %2854 = vmatprep.subr.bf16.mxu1 %v3542_v3 }
 0x6bd   : > { %2855 = vmatpush3.bf16.msra.mxu1 %v3053_v14 }
 0x6be   : > { %2856 = vmatprep.subr.bf16.mxu1 %v3542_v3 }
 0x6c1   : > { %2857 = vmatpush3.bf16.msra.mxu1 %v3054_v15 }
 0x6c2   : > { %2870 = vmatprep.subr.bf16.mxu1 (!%p2717_p13), %v3548_v49 }
 0x744   : > { %v1752_v55 = vpop.xlane.xlu0 %1751 }
 0x745   : > { %v1754_v56 = vmul.f32 0.03125, %v1752_v55 }
 0x747   : > { %v1755_v57 = vsub.f32 %v1747_v53, %v1754_v56  ;;  %v3079_v56 = vld [vmem:[%s4632_s20 + $0x20] sm:$0xff] (!%p2717_p13)  }
 0x749   : > { %v1756_v58 = vmul.f32 %v1755_v57, %v1755_v57 }
 0x74b   : > { %v1757_v59 = vsel %vm1078_vm2, %v1756_v58, 0.0  ;;  %v3080_v58 = vld [vmem:[%s4632_s20 + $0x28] sm:$0xff] (!%p2717_p13)  }
 0x74c   : > { %1758 = vadd.xlane.f32.xlu1 %v1757_v59  ;;  %v2149_v59 = vld [vmem:[%s4633_s21] sm:$0x7] (!%p2717_p13) }
 0x74d   : > { %v2151_v5 = vrot.slane (!%p2717_p13), %v2149_v59, 1 }
 0x7d9   : > { %v1759_v0 = vpop.xlane.xlu1 %1758 }
 0x7da   : > { %v1760_v33 = vmul.f32 0.03125, %v1759_v0 }
 0x7dc   : > { %v1761_v1 = vadd.f32 1e-05, %v1760_v33 }
 0x7de   : > { %3071 = vrsqrt.f32 %v1761_v1 }
 0x7e8   : > { %v3072_v2 = vpop.eup %3071 }
 0x7e9   : > { %v1763_v6 = vmul.f32 %v3072_v2, %v1755_v57 }
 0x7eb   : > { %v1770_v10 = vmul.f32 %v2703_v4, %v1763_v6 }
 0x7ed   : > { %v1777_v11 = vadd.f32 %v2704_v9, %v1770_v10  ;;  %v2152_v9 = vrot.slane (!%p2717_p13), %v2149_v59, 2 }
 0x7ef   : > { %v1778_v12 = vpack.c.bf16 %v1777_v11, %v1777_v11 }
 0x7f1   : > { %2847 = vmatmul.mubr.msk.bf16.vlgmr.msra.gmra.mrb[20].mxu0 %vm1078_vm2, %v1778_v12 }
 0x7f2   : > { %2863 = vmatpush3.bf16.msra.mxu0 (!%p2717_p13), %v3075_v48  ;;  %2866 = vmatprep.mubr.msk.bf16.mxu0 (!%p2717_p13), %vm3549_vm9, %v3548_v49 }
 0x7f3   : > { %2864 = vmatprep.subr.bf16.mxu0 (!%p2717_p13), %v3548_v49 }
 0x7f6   : > { %2865 = vmatpush3.bf16.msra.mxu0 (!%p2717_p13), %v3077_v13 }
 0x7f7   : > { %2878 = vmatprep.subr.bf16.mxu0 (!%p2717_p13), %v3548_v49 }
 0x8c4   : > { %v1839_v17 = vpop.f32.mrb[20].mxu0 }
 0x8c5   : > { %v1840_v19 = vadd.f32 %v2705_v16, %v1839_v17  ;;  %v2848_v20 = vpop.f32.mrb[21].mxu0 }
 0x8c6   : > { %v1842_v22 = vpop.f32.mrb[22].mxu0 }
 0x8c7   : > { %v1845_v23 = vmul.f32 0.02, %v1840_v19  ;;  %v2849_v26 = vpop.f32.mrb[23].mxu0 }
 0x8c9   : > { %v1846_v28 = vmax.f32 %v1840_v19, %v1845_v23 }
 0x8cb   : > { %v1847_v29 = vpack.c.bf16 %v1846_v28, %v1846_v28 }
 0x8cd   : > { %2859 = vmatmul.mubr.msk.bf16.vlgmr.msra.gmra.mrb[20].mxu1 %vm1887_vm8, %v1847_v29 }
 0x8ce   : > { %2871 = vmatpush3.bf16.msra.mxu1 (!%p2717_p13), %v3076_v63  ;;  %2874 = vmatprep.mubr.msk.bf16.mxu1 (!%p2717_p13), %vm3549_vm9, %v3548_v49 }
 0x8cf   : > { %2872 = vmatprep.subr.bf16.mxu1 (!%p2717_p13), %v3548_v49 }
 0x8d2   : > { %2873 = vmatpush3.bf16.msra.mxu1 (!%p2717_p13), %v3078_v18 }
 0x9a0   : > { %v1925_v31 = vpop.f32.mrb[20].mxu1 }
 0x9a1   : > { %v1926_v32 = vadd.f32 %v2709_v30, %v1925_v31  ;;  %v2860_v34 = vpop.f32.mrb[21].mxu1 }
 0x9a2   : > { %v1928_v3 = vpop.f32.mrb[22].mxu1 }
 0x9a3   : > { %v2861_v35 = vpop.f32.mrb[23].mxu1  ;;  %v1931_v36 = vadd.f32 %v1926_v32, %v1777_v11 }
 0x9a5   : > { %v1934_v37 = vsel %vm1078_vm2, %v1931_v36, 0.0 }
 0x9a6   : > { %1935 = vadd.xlane.f32.xlu0 %v1934_v37 }
 0xa33   : > { %v1936_v21 = vpop.xlane.xlu0 %1935 }
 0xa34   : > { %v1937_v24 = vmul.f32 0.03125, %v1936_v21 }
 0xa36   : > { %v1938_v38 = vsub.f32 %v1931_v36, %v1937_v24 }
 0xa38   : > { %v1939_v27 = vmul.f32 %v1938_v38, %v1938_v38 }
 0xa3a   : > { %v1940_v39 = vsel %vm1078_vm2, %v1939_v27, 0.0 }
 0xa3b   : > { %1941 = vadd.xlane.f32.xlu0 %v1940_v39 }
 0xac8   : > { %v1942_v40 = vpop.xlane.xlu0 %1941 }
 0xac9   : > { %v1943_v25 = vmul.f32 0.03125, %v1942_v40 }
 0xacb   : > { %v1944_v41 = vadd.f32 1e-05, %v1943_v25 }
 0xacd   : > { %3073 = vrsqrt.f32 %v1944_v41  ;;  %v2159_v41 = vld [vmem:[%s4634_s7] sm:$0x7] (!%p2717_p13) }
 0xace   : > { %v2213_v48 = vrot.slane (!%p2717_p13), %v2159_v41, 2 }
 0xad7   : > { %v3074_v42 = vpop.eup %3073 }
 0xad8   : > { %v1946_v44 = vmul.f32 %v3074_v42, %v1938_v38  ;;  %1965 = sbr.rel (%p2717_p13) target bundleno = 3513 (0xdb9), region = 140 }
 0xada   : > { %v1953_v46 = vmul.f32 %v2715_v43, %v1946_v44  ;;  %v2160_v43 = vld [vmem:[%s4635_s26] sm:$0x7] (!%p2717_p13)  ;;  %v2212_v44 = vrot.slane (!%p2717_p13), %v2159_v41, 1 }
 0xadb   : > { %v2221_v13 = vrot.slane (!%p2717_p13), %v2160_v43, 1 }
 0xadc   : > { %v1960_v47 = vadd.f32 %v2716_v45, %v1953_v46 }
 0xade   : > { %1961 = vst.msk [vmem:[%s4139_s16] sm:$0xff] %vm1078_vm2, %v1960_v47  ;;  %v1970_v8 = vsel (!%p2717_p13), %vm1078_vm2, %v1960_v47, 0.0 }
 0xadf   : > { %v1971_v50 = vrot.slane %v1970_v8, 4 }
 0xae1   : > { %v1972_v51 = vadd.f32 %v1971_v50, %v1970_v8  ;;  %v2222_v8 = vrot.slane %v2160_v43, 2 }
 0xae3   : > { %v1973_v52 = vrot.slane %v1972_v51, 2 }
 0xae5   : > { %v1974_v53 = vadd.f32 %v1973_v52, %v1972_v51 }
 0xae7   : > { %v1975_v54 = vrot.slane %v1974_v53, 1 }
 0xae9   : > { %v1976_v55 = vadd.f32 %v1975_v54, %v1974_v53 }
 0xaeb   : > { %v1977_v57 = vpack.c.bf16 %v1976_v55, %v1976_v55 }
 0xaed   : > { %2867 = vmatmul.mubr.msk.bf16.vlgmr.msra.gmra.mrb[0].mxu0 %vm1078_vm2, %v1977_v57  ;;  %2875 = vmatmul.mubr.msk.bf16.vlgmr.msra.gmra.mrb[0].mxu1 %vm1078_vm2, %v1977_v57 }
 0xaee   : > { %2879 = vmatpush3.bf16.msra.mxu0 %v3079_v56  ;;  %2882 = vmatprep.mubr.msk.bf16.mxu0 %vm3549_vm9, %v3548_v49 }
 0xaef   : > { %2880 = vmatprep.subr.bf16.mxu0 %v3548_v49 }
 0xaf2   : > { %2881 = vmatpush3.bf16.msra.mxu0 %v3080_v58 }
 0xaf5   : > { %2883 = vmatmul.mubr.msk.bf16.vlgmr.msra.gmra.mrb[4].mxu0 %vm1078_vm2, %v1977_v57 }
 0xbc0   : > { %v2039_v60 = vpop.f32.mrb[0].mxu0  ;;  %v2091_v61 = vpop.f32.mrb[0].mxu1 }
 0xbc1   : > { %v2868_v62 = vpop.f32.mrb[1].mxu0  ;;  %v2876_v0 = vpop.f32.mrb[1].mxu1  ;;  %v2157_v6 = vadd.f32 %v2151_v5, %v2091_v61  ;;  %v2156_v15 = vadd.f32 %v2149_v59, %v2039_v60 }
 0xbc2   : > { %v2042_v33 = vpop.f32.mrb[2].mxu0  ;;  %v2094_v1 = vpop.f32.mrb[2].mxu1 }
 0xbc3   : > { %v2869_v2 = vpop.f32.mrb[3].mxu0  ;;  %v2877_v4 = vpop.f32.mrb[3].mxu1  ;;  %v2164_v10 = vrot.slane %v2157_v6, 7 }
 0xbc5   : > { %v2166_v20 = vsel %vm2165_vm10, %v2164_v10, %v2156_v15 }
 0xbc8   : > { %v2143_v11 = vpop.f32.mrb[4].mxu0 }
 0xbc9   : > { %v2158_v12 = vadd.f32 %v2152_v9, %v2143_v11  ;;  %v2884_v14 = vpop.f32.mrb[5].mxu0 }
 0xbca   : > { %v2146_v16 = vpop.f32.mrb[6].mxu0 }
 0xbcb   : > { %v2167_v17 = vrot.slane %v2158_v12, 6  ;;  %v2885_v19 = vpop.f32.mrb[7].mxu0 }
 0xbcc   : > { %v2269_v19 = vld [vmem:[%s4636_s9] sm:$0x7] }
 0xbcd   : > { %v2169_v22 = vsel %vm2168_vm11, %v2167_v17, %v2166_v20 }
 0xbce   : > { %v2172_v23 = vsel %vm2171_vm12, %v2169_v22, 0.0 }
 0xbcf   : > { %2173 = vadd.xlane.f32.xlu0 %v2172_v23 }
 0xc5c   : > { %v2174_v26 = vpop.xlane.xlu0 %2173 }
 0xc5d   : > { %v2175_v28 = vmul.f32 0.03125, %v2174_v26 }
 0xc5f   : > { %v2177_v29 = vrot.slane %v2175_v28, 1  ;;  %v2178_v30 = vrot.slane %v2175_v28, 2  ;;  %v2182_v31 = vsub.f32 %v2156_v15, %v2175_v28 }
 0xc61   : > { %v2183_v32 = vsub.f32 %v2157_v6, %v2177_v29  ;;  %v2184_v34 = vsub.f32 %v2158_v12, %v2178_v30  ;;  %v2185_v36 = vmul.f32 %v2182_v31, %v2182_v31  ;;  %v2274_v29 = vld [vmem:[%s4637_s27] sm:$0x7] }
 0xc63   : > { %v2186_v3 = vmul.f32 %v2183_v32, %v2183_v32  ;;  %v2187_v35 = vmul.f32 %v2184_v34, %v2184_v34 }
 0xc65   : > { %v2191_v37 = vrot.slane %v2186_v3, 7  ;;  %v2193_v21 = vrot.slane %v2187_v35, 6 }
 0xc67   : > { %v2192_v24 = vsel %vm2165_vm10, %v2191_v37, %v2185_v36 }
 0xc68   : > { %v2194_v38 = vsel %vm2168_vm11, %v2193_v21, %v2192_v24 }
 0xc69   : > { %v2196_v27 = vsel %vm2171_vm12, %v2194_v38, 0.0 }
 0xc6a   : > { %2197 = vadd.xlane.f32.xlu0 %v2196_v27 }
 0xcf7   : > { %v2198_v39 = vpop.xlane.xlu0 %2197 }
 0xcf8   : > { %v2199_v40 = vmul.f32 0.03125, %v2198_v39 }
 0xcfa   : > { %v2200_v25 = vadd.f32 1e-05, %v2199_v40 }
 0xcfc   : > { %3081 = vrsqrt.f32 %v2200_v25 }
 0xd06   : > { %v3082_v42 = vpop.eup %3081 }
 0xd07   : > { %v2203_v45 = vrot.slane %v3082_v42, 1  ;;  %v2204_v46 = vrot.slane %v3082_v42, 2  ;;  %v2208_v47 = vmul.f32 %v3082_v42, %v2182_v31 }
 0xd09   : > { %v2209_v49 = vmul.f32 %v2203_v45, %v2183_v32  ;;  %v2210_v63 = vmul.f32 %v2204_v46, %v2184_v34  ;;  %v2217_v18 = vmul.f32 %v2208_v47, %v2159_v41 }
 0xd0b   : > { %v2218_v50 = vmul.f32 %v2212_v44, %v2209_v49  ;;  %v2219_v51 = vmul.f32 %v2213_v48, %v2210_v63  ;;  %v2226_v54 = vadd.f32 %v2217_v18, %v2160_v43 }
 0xd0d   : > { %v2227_v52 = vadd.f32 %v2221_v13, %v2218_v50  ;;  %v2228_v53 = vadd.f32 %v2222_v8, %v2219_v51  ;;  %v2230_v59 = vmul.f32 0.02, %v2226_v54  ;;  %v2237_v0 = vmax.f32 %v2226_v54, 0.0 }
 0xd0f   : > { %v2231_v55 = vmul.f32 0.02, %v2227_v52  ;;  %3083 = vtanh.f32 %v2227_v52  ;;  %v2232_v56 = vmul.f32 0.02, %v2228_v53  ;;  %v2238_v57 = vmax.f32 %v2227_v52, 0.0 }
 0xd10   : > { %3085 = vtanh.f32 %v2228_v53  ;;  %v2239_v60 = vmax.f32 %v2228_v53, 0.0  ;;  %v2233_v1 = vmax.f32 %v2226_v54, %v2230_v59 }
 0xd11   : > { %3087 = vtanh.f32 %v2226_v54  ;;  %v2234_v58 = vmax.f32 %v2227_v52, %v2231_v55  ;;  %v2235_v61 = vmax.f32 %v2228_v53, %v2232_v56  ;;  %v2246_v5 = vrot.slane %v2238_v57, 7 }
 0xd12   : > { %v2248_v2 = vrot.slane %v2239_v60, 6 }
 0xd13   : > { %v2263_v62 = vrot.slane %v2234_v58, 7  ;;  %v2247_v6 = vsel %vm2165_vm10, %v2246_v5, %v2237_v0  ;;  %v2265_v10 = vrot.slane %v2235_v61, 6 }
 0xd14   : > { %v2249_v16 = vsel %vm2168_vm11, %v2248_v2, %v2247_v6 }
 0xd15   : > { %v2264_v14 = vsel %vm2165_vm10, %v2263_v62, %v2233_v1 }
 0xd16   : > { %v2266_v22 = vsel %vm2168_vm11, %v2265_v10, %v2264_v14 }
 0xd19   : > { %v3084_v33 = vpop.eup %3083 }
 0xd1a   : > { %v3086_v4 = vpop.eup %3085  ;;  %v2254_v9 = vrot.slane %v3084_v33, 7 }
 0xd1b   : > { %v3088_v11 = vpop.eup %3087  ;;  %v2256_v12 = vrot.slane %v3086_v4, 6 }
 0xd1c   : > { %v2255_v15 = vsel %vm2165_vm10, %v2254_v9, %v3088_v11 }
 0xd1d   : > { %v2257_v17 = vsel %vm2168_vm11, %v2256_v12, %v2255_v15 }
 0xd1e   : > { %v2259_v20 = vsel %vm2236_vm13, %v2249_v16, %v2257_v17 }
 0xd1f   : > { %v2268_v23 = vsel %vm2229_vm14, %v2266_v22, %v2259_v20 }
 0xd20   : > { %v2270_v26 = vmul.f32 %v2269_v19, %v2268_v23 }
 0xd22   : > { %v2271_v28 = vsel %vm2171_vm12, %v2270_v26, 0.0 }
 0xd23   : > { %2272 = vadd.xlane.f32.xlu1 %v2271_v28 }
 0xdb0   : > { %v2273_v30 = vpop.xlane.xlu1 %2272 }
 0xdb1   : > { %v2275_v31 = vadd.f32 %v2274_v29, %v2273_v30 }
 0xdb3   : > { %v2276_v32 = vmul.f32 0.02, %v2275_v31  ;;  %v2278_v3 = vmax.f32 %v2275_v31, 0.0 }
 0xdb5   : > { %v2277_v34 = vmax.f32 %v2275_v31, %v2276_v32 }
 0xdb7   : > { %v2279_v35 = vsel %vm2229_vm14, %v2277_v34, %v2278_v3 }
 0xdb8   : > { %2281 = vst.msk [vmem:[%s4131_s3] sm:$0x7] %vm2280_vm15, %v2279_v35 }
 0xdb9 PF: > { %s4638_s30 = sld [smem:[#allocation42_spill]]  ;;  %s4639_s6 = sld [smem:[#allocation40_spill]] }
 0xdba   : > { %s2729_s18 = sshll.u32 %s3517_s0, 7  ;;  %s4640_s29 = sld [smem:[#allocation62_spill]] }
 0xdbb   : > { %s2305_s19 = sshll.u32 %s4139_s16, 4  ;;  %s3550_s3 = smov [#allocation17]   ;;  %s2306_s19 = int_to_ptr.vmem [resolvable:$true] %s2305_s19 }
 0xdbc   : > { %s3359_s1 = scalar_lea.vmem %s2306_s19, 128  ;;  %s3363_s10 = sshll.u32 %s3550_s3, 4  ;;  %s3364_s10 = int_to_ptr.vmem [resolvable:$false] %s3363_s10 }
 0xdbd   : > { %p3360_p5 = scmp.ne.s32.totalorder %s2306_s19, %s3359_s1  ;;  %s3365_s12 = scalar_lea.vmem %s3364_s10, 256 }
 0xdbe   : > { %p3366_p10 = scmp.lt.s32.totalorder %s2306_s19, %s3364_s10  ;;  %p3367_p11 = scmp.lt.s32.totalorder %s3365_s12, %s3359_s1 }
 0xdbf   : > { %s2283_s28 = scalar_lea.sflag [#allocation4], %s4638_s30  ;;  %p4642_p2 = scmp.ne.s32.totalorder %s4639_s6, 0 }
 0xdc0   : > { %s4641_s8 = smov %s4640_s29  ;;  %s4399_s23 = scalar_lea.hbm %s4640_s29, %s2729_s18 }
 0xdc1   : > { %p3361_p9 = pnand %p3360_p5, %p4642_p2  ;;  %p3368_p0 = por %p3367_p11, %p3366_p10 }
 0xdc3   : > { %p3362_p8 = pneg %p3361_p9 }
 0xdc5   : > { %p3369_p6 = pnand %p3368_p0, %p3362_p8 }
 0xdc7   : > { %3372 = shalt.err (!%p3369_p6)
}
 0xdc8   : > { %s3373_s16 = scalar_lea.hbm %s4399_s23, 128  ;;  %s3377_s4 = scalar_lea.hbm %s4641_s8, 256 }
 0xdc9   : > { %p3374_p3 = scmp.ne.s32.totalorder %s4399_s23, %s3373_s16  ;;  %p3378_p4 = scmp.lt.u32.totalorder %s4399_s23, %s4641_s8 }
 0xdca   : > { %p3379_p1 = scmp.lt.u32.totalorder %s3377_s4, %s3373_s16  ;;  %p3381_p5 = scmp.lt.u32.totalorder %s3373_s16, %s4399_s23 }
 0xdcb   : > { %p3375_p7 = pnand %p3374_p3, %p4642_p2 }
 0xdcc   : > { %p3380_p13 = por %p3379_p1, %p3378_p4 }
 0xdcd   : > { %p3376_p12 = pneg %p3375_p7 }
 0xdce   : > { %p3382_p9 = por %p3381_p5, %p3380_p13 }
 0xdd0   : > { %p3383_p8 = pnand %p3382_p9, %p3376_p12 }
 0xdd2   : > { %3386 = shalt.err (!%p3383_p8)
}
 0xdd3   : > { %2904 = dma.vmem_to_hbm [thread:$0]  (%p4642_p2), %s2306_s19, 128, %s4399_s23, %s2283_s28  }
 0xdd4   : > { %s2738_s2 = sshll.u32 %s3517_s0, 9  ;;  %s2318_s26 = sshll.u32 %s4141_s17, 4  ;;  %s4427_s26 = int_to_ptr.vmem [resolvable:$true] %s2318_s26 }
 0xdd5   : > { %s4643_s9 = sld [smem:[#allocation63_spill]]  ;;  %s2288_s14 = scalar_lea.sflag [#allocation19], %s4638_s30 }
 0xdd6   : > { %s3387_s27 = scalar_lea.vmem %s4427_s26, 512  ;;  %s3551_s18 = smov [#allocation18]  }
 0xdd7   : > { %p3388_p10 = scmp.ne.s32.totalorder %s4427_s26, %s3387_s27  ;;  %s3391_s24 = sshll.u32 %s3551_s18, 4  ;;  %s3392_s24 = int_to_ptr.vmem [resolvable:$false] %s3391_s24 }
 0xdd8   : > { %s3393_s0 = scalar_lea.vmem %s3392_s24, 1024  ;;  %p3394_p6 = scmp.lt.s32.totalorder %s4427_s26, %s3392_s24 }
 0xdd9   : > { %p3389_p11 = pnand %p3388_p10, %p4642_p2  ;;  %p3395_p3 = scmp.lt.s32.totalorder %s3393_s0, %s3387_s27 }
 0xddb   : > { %s4425_s5 = scalar_lea.hbm %s4643_s9, %s2738_s2  ;;  %p3390_p0 = pneg %p3389_p11 }
 0xddc   : > { %p3396_p7 = por %p3395_p3, %p3394_p6 }
 0xdde   : > { %p3397_p12 = pnand %p3396_p7, %p3390_p0 }
 0xde0   : > { %3400 = shalt.err (!%p3397_p12)
}
 0xde1   : > { %s3401_s17 = scalar_lea.hbm %s4425_s5, 512  ;;  %s3405_s23 = scalar_lea.hbm %s4643_s9, 1024 }
 0xde2   : > { %p3402_p4 = scmp.ne.s32.totalorder %s4425_s5, %s3401_s17  ;;  %p3406_p5 = scmp.lt.u32.totalorder %s4425_s5, %s4643_s9 }
 0xde3   : > { %p3407_p9 = scmp.lt.u32.totalorder %s3405_s23, %s3401_s17  ;;  %p3409_p10 = scmp.lt.u32.totalorder %s3401_s17, %s4425_s5 }
 0xde4   : > { %p3403_p1 = pnand %p3402_p4, %p4642_p2 }
 0xde5   : > { %p3408_p8 = por %p3407_p9, %p3406_p5 }
 0xde6   : > { %p3404_p13 = pneg %p3403_p1 }
 0xde7   : > { %p3410_p11 = por %p3409_p10, %p3408_p8 }
 0xde9   : > { %p3411_p0 = pnand %p3410_p11, %p3404_p13 }
 0xdeb   : > { %3414 = shalt.err (!%p3411_p0)
}
 0xdec   : > { %s3552_s1 = smov 128   ;;  %s3553_s3 = smov 8  }
 0xded   : > { %2905 = dma.vmem_to_hbm [thread:$0]  (%p4642_p2), %s4427_s26, 512, %s4425_s5, %s2288_s14, %s3552_s1, %s3552_s1, %s3553_s3  }
 0xdee PF: > { %s4644_s10 = sld [smem:[#allocation35_spill]]  ;;  %s4645_s12 = sld [smem:[#allocation27_spill]] }
 0xdef   : > { %s4646_s16 = sld [smem:[#allocation41_spill]] }
 0xdf4   : > { %p2944_p6 = scmp.ge.s32.totalorder %s4644_s10, 2  ;;  %s2336_s21 = sand.u32 1, %s4645_s12  }
 0xdf5   : > { %p4647_p3 = scmp.ne.s32.totalorder %s4646_s16, 0  ;;  %s2337_s25 = scalar_lea.sflag [#allocation4], %s2336_s21 }
 0xdf7   : > { %p2937_p7 = pnand %p2944_p6, %p4647_p3 }
 0xdf9   : > { %3480 = dma.done.wait (!%p2937_p7), %s2337_s25, 128  }
 0xdfa   : > { %3482 = vsyncadd (!%p2937_p7), %s2337_s25, 4294967168  ;;  %s2346_s4 = scalar_lea.sflag [#allocation19], %s2336_s21 }
 0xdfb   : > { %3484 = dma.done.wait (!%p2937_p7), %s2346_s4, 512  }
 0xdfc   : > { %3486 = vsyncadd (!%p2937_p7), %s2346_s4, 4294966784  ;;  %s53_s5 = sadd.s32 1, %s4644_s10   ;;  %s4648_s2 = sld [smem:[#allocation28_spill]] }
 0xdfd   : > { %p50_p12 = scmp.ge.s32.totalorder %s53_s5, 6   ;;  %s4649_s25 = sld [smem:[#allocation29_spill]] }
 0xdfe   : > { %s4650_s26 = sld [smem:[#allocation39_spill]]  ;;  %s4651_s27 = sld [smem:[#allocation30_spill]] }
 0xdff   : > { %s4652_s3 = sld [smem:[#allocation31_spill]]  ;;  %s4653_s28 = sld [smem:[#allocation38_spill]] }
 0xe00   : > { %s4654_s29 = sld [smem:[#allocation33_spill]]  ;;  %s4655_s0 = sld [smem:[#allocation34_spill]] }
 0xe01   : > { %s4656_s4 = sld [smem:[#allocation36_spill]]  ;;  %s4657_s30 = sld [smem:[#allocation37_spill]] }
 0xe02   :  { %52 = sbr.rel (!%p50_p12) target bundleno = 42 (0x2a), region = 286 }
 0xe09   :  { %2358 = vsyncpa [#allocation3], 1 }
 0xe0a   :  { %2360 = vsyncpa [#allocation3 + $0x1], 1 }
 0xe0b   :  { %2361 = vsyncpa [#allocation6], 1 }
 0xe0c   :  { %2363 = vsyncpa [#allocation6 + $0x1], 1 }
 0xe0d   :  { %2364 = vsyncpa [#allocation9], 1 }
 0xe0e   :  { %2366 = vsyncpa [#allocation9 + $0x1], 1 }
 0xe0f   :  { %2367 = vsyncpa [#allocation12], 1 }
 0xe10   :  { %2369 = vsyncpa [#allocation12 + $0x1], 1 }
 0xe11   :  { %2370 = vsyncpa [#allocation15], 1 }
 0xe12   :  { %2372 = vsyncpa [#allocation15 + $0x1], 1 }
 0xe13   :  { %2373 = vsyncpa [#allocation4], 1 }
 0xe14   :  { %2375 = vsyncpa [#allocation4 + $0x1], 1 }
 0xe15   :  { %2376 = vsyncpa [#allocation19], 1 }
 0xe16   :  { %2378 = vsyncpa [#allocation19 + $0x1], 1 }

</bundles_post_ra>
